<compile_context>
chip_gen: v7x
topology: tpu7x:2x2x1
jax: 0.10.0
libtpu: 0.0.40
codegen_flags: <defaults>
</compile_context>

<pallas_src>
import functools

import jax
import jax.numpy as jnp
from jax.experimental import pallas as pl
from jax.experimental.pallas import tpu as pltpu

EPS = 1e-5  # PyTorch nn.LayerNorm default eps
VMEM_LIMIT = 64 * 1024 * 1024  # <= physical VMEM on v5e/v6e (128 MiB) and v7x (64 MiB)


# -----------------------------------------------------------------------------
# Kernel 1: row-tiled LayerNorm + fused QKV projection over flattened (B*L, D).
# -----------------------------------------------------------------------------
def ln_qkv_kernel(x_ref, gamma_ref, beta_ref, w_in_ref, b_in_ref, qkv_ref):
    x = x_ref[...]                                               # (R, D) f32
    mean = jnp.mean(x, axis=-1, keepdims=True)
    var = jnp.mean((x - mean) ** 2, axis=-1, keepdims=True)      # biased, like PyTorch
    xn = (x - mean) * jax.lax.rsqrt(var + EPS)
    xn = xn * gamma_ref[...] + beta_ref[...]                     # f32 LN affine
    qkv = jnp.dot(xn.astype(jnp.bfloat16), w_in_ref[...],        # bf16 x bf16, f32 accum
                  preferred_element_type=jnp.float32)
    qkv_ref[...] = (qkv + b_in_ref[...]).astype(qkv_ref.dtype)   # stored bf16


# -----------------------------------------------------------------------------
# Kernel 2: grid = (B,).  All heads of one batch block: per-head softmax attention,
# lane-concat of contexts, ONE full-K output projection, bias + residual, single store.
# -----------------------------------------------------------------------------
def attn_block_kernel(qkv_ref, w_out_ref, b_out_ref, x_ref, y_ref, attn_ref=None,
                      *, num_heads, head_dim):
    D = num_heads * head_dim
    qkv = qkv_ref[...]                                           # (L, 3D) bf16, Q pre-scaled

    ctx_parts = []
    attn_acc = None
    for h in range(num_heads):                                   # static unroll over heads
        lo = h * head_dim
        hi = lo + head_dim
        q_h = qkv[:, lo:hi]                                      # (L, dh) bf16
        k_h = qkv[:, D + lo:D + hi]
        v_h = qkv[:, 2 * D + lo:2 * D + hi]

        s = jax.lax.dot_general(q_h, k_h, (((1,), (1,)), ((), ())),
                                preferred_element_type=jnp.float32)   # (L, L) f32
        s = s - jnp.max(s, axis=-1, keepdims=True)
        e = jnp.exp(s)
        p = e * pl.reciprocal(jnp.sum(e, axis=-1, keepdims=True), approx=True)

        ctx_parts.append(jnp.dot(p.astype(jnp.bfloat16), v_h,
                                 preferred_element_type=jnp.float32))  # (L, dh) f32
        if attn_ref is not None:
            attn_acc = p if attn_acc is None else attn_acc + p

    # concat heads along lanes -> (L, D), one full-K matmul against W_out^T
    ctx = jnp.concatenate(ctx_parts, axis=-1).astype(jnp.bfloat16)
    proj = jnp.dot(ctx, w_out_ref[...], preferred_element_type=jnp.float32)  # (L, D) f32

    # y = x + ctx @ W_out^T + b_out   (written exactly once per batch block)
    y_ref[...] = (x_ref[...] + proj + b_out_ref[...]).astype(y_ref.dtype)

    if attn_ref is not None:  # optional head-averaged attention weights
        attn_ref[0] = attn_acc * (1.0 / num_heads)


def _row_tile(n, target=512):
    """Largest row tile <= target that divides n (keeping the sublane dim aligned)."""
    for t in range(min(n, target), 0, -1):
        if n % t == 0 and (t % 8 == 0 or t == n):
            return t
    return n


# -----------------------------------------------------------------------------
# One-time parameter preparation (hoisted out of the jitted forward).
# -----------------------------------------------------------------------------
def prepare_translayer_params(params, num_heads=8):
    D = params["gamma"].shape[0]
    dh = D // num_heads
    scale = 1.0 / (dh ** 0.5)
    # fold 1/sqrt(dh) into the Q rows of in_proj weight/bias (one-time transform)
    qscale = jnp.concatenate([jnp.full((D,), scale, jnp.float32),
                              jnp.ones((2 * D,), jnp.float32)])
    return {
        "gamma": params["gamma"].reshape(1, D).astype(jnp.float32),
        "beta": params["beta"].reshape(1, D).astype(jnp.float32),
        "w_in_t": (params["in_proj_weight"] * qscale[:, None]).T.astype(jnp.bfloat16),
        "b_in": (params["in_proj_bias"] * qscale).reshape(1, 3 * D).astype(jnp.float32),
        "w_out_t": params["out_proj_weight"].T.astype(jnp.bfloat16),   # (D, D)
        "b_out": params["out_proj_bias"].reshape(1, D).astype(jnp.float32),
    }


def translayer_orig(x, prepped, num_heads=8, return_attn=False):
    """TransLayer('Orig') forward: returns x + MHA(LN(x)) (and optionally avg attn).

    Matches nn.MultiheadAttention(batch_first=True), average_attn_weights=True,
    no masks, no dropout (eval mode).  `prepped` comes from prepare_translayer_params."""
    B, L, D = x.shape
    H = num_heads
    assert D % H == 0, "embed dim must be divisible by num_heads"
    dh = D // H
    BL = B * L

    x_flat = x.reshape(BL, D)

    # ---- kernel 1: LayerNorm + fused QKV projection over flattened rows ----
    R = _row_tile(BL, target=512)
    qkv_flat = pl.pallas_call(
        ln_qkv_kernel,
        out_shape=jax.ShapeDtypeStruct((BL, 3 * D), jnp.bfloat16),
        grid=(BL // R,),
        in_specs=[
            pl.BlockSpec((R, D), lambda i: (i, 0)),              # x rows
            pl.BlockSpec((1, D), lambda i: (0, 0)),              # gamma
            pl.BlockSpec((1, D), lambda i: (0, 0)),              # beta
            pl.BlockSpec((D, 3 * D), lambda i: (0, 0)),          # in_proj_weight.T (bf16)
            pl.BlockSpec((1, 3 * D), lambda i: (0, 0)),          # in_proj_bias (scaled)
        ],
        out_specs=pl.BlockSpec((R, 3 * D), lambda i: (i, 0)),
        compiler_params=pltpu.CompilerParams(
            dimension_semantics=("parallel",), vmem_limit_bytes=VMEM_LIMIT),
    )(x_flat, prepped["gamma"], prepped["beta"], prepped["w_in_t"], prepped["b_in"])

    # ---- kernel 2: per-batch attention + fused output projection + residual ----
    y_spec = pl.BlockSpec((L, D), lambda b: (b, 0))
    if return_attn:
        out_shape = (jax.ShapeDtypeStruct((BL, D), x.dtype),
                     jax.ShapeDtypeStruct((B, L, L), jnp.float32))
        out_specs = (y_spec, pl.BlockSpec((1, L, L), lambda b: (b, 0, 0)))
    else:
        out_shape = jax.ShapeDtypeStruct((BL, D), x.dtype)
        out_specs = y_spec

    result = pl.pallas_call(
        functools.partial(attn_block_kernel, num_heads=H, head_dim=dh),
        out_shape=out_shape,
        grid=(B,),
        in_specs=[
            pl.BlockSpec((L, 3 * D), lambda b: (b, 0)),          # qkv rows of this batch
            pl.BlockSpec((D, D), lambda b: (0, 0)),              # W_out^T (bf16)
            pl.BlockSpec((1, D), lambda b: (0, 0)),              # out_proj bias
            pl.BlockSpec((L, D), lambda b: (b, 0)),              # x (residual)
        ],
        out_specs=out_specs,
        compiler_params=pltpu.CompilerParams(
            dimension_semantics=("parallel",), vmem_limit_bytes=VMEM_LIMIT),
    )(qkv_flat, prepped["w_out_t"], prepped["b_out"], x_flat)

    if return_attn:
        y_flat, attn = result
        return y_flat.reshape(B, L, D), attn
    return result.reshape(B, L, D)


# -----------------------------------------------------------------------------
# Pure-JAX references (mirror the kernel's bf16-at-the-MXU precision choices).
# -----------------------------------------------------------------------------
def _layernorm(x, gamma, beta):
    mean = jnp.mean(x, axis=-1, keepdims=True)
    var = jnp.mean((x - mean) ** 2, axis=-1, keepdims=True)
    return (x - mean) / jnp.sqrt(var + EPS) * gamma + beta


def translayer_ref(x, params, num_heads=8, mxu_dtype=jnp.bfloat16):
    B, L, D = x.shape
    H, dh = num_heads, D // num_heads
    c = lambda t: t.astype(mxu_dtype)
    xn = _layernorm(x, params["gamma"], params["beta"])
    qkv = jnp.einsum("bld,ed->ble", c(xn), c(params["in_proj_weight"]),
                     preferred_element_type=jnp.float32) + params["in_proj_bias"]
    q, k, v = qkv[..., :D], qkv[..., D:2 * D], qkv[..., 2 * D:]
    split = lambda t: t.reshape(B, L, H, dh).transpose(0, 2, 1, 3)
    qh = split(q) * (1.0 / dh ** 0.5)
    kh, vh = split(k), split(v)
    s = jnp.einsum("bhld,bhmd->bhlm", c(qh), c(kh), preferred_element_type=jnp.float32)
    p = jax.nn.softmax(s, axis=-1)
    o = jnp.einsum("bhlm,bhmd->bhld", c(p), c(vh), preferred_element_type=jnp.float32)
    o = o.transpose(0, 2, 1, 3).reshape(B, L, D)
    y = jnp.einsum("bld,ed->ble", c(o), c(params["out_proj_weight"]),
                   preferred_element_type=jnp.float32) + params["out_proj_bias"]
    return x + y, p.mean(axis=1)


# -----------------------------------------------------------------------------
# Transformer_End (agg pooling + two TransLayers).  fc1/fc2/final-norm are thin
# dense ops left to XLA; the attention layers use the Pallas kernels above with
# return_attn=False since Transformer_End discards the attention weights.
# -----------------------------------------------------------------------------
def prepare_end_params(tp, num_heads=8):
    out = dict(tp)
    out["layer1"] = prepare_translayer_params(tp["layer1"], num_heads)
    out["layer2"] = prepare_translayer_params(tp["layer2"], num_heads)
    return out


def transformer_end_forward(data, tp, agg="avg", num_heads=8, use_kernel=True):
    h = jnp.maximum(jnp.einsum("bnf,df->bnd", data, tp["fc1_w"]) + tp["fc1_b"], 0.0)
    if agg == "cls_token":
        cls = jnp.broadcast_to(tp["cls_token"], (h.shape[0], 1, h.shape[-1]))
        h = jnp.concatenate([cls, h], axis=1)
    if use_kernel:
        h = translayer_orig(h, tp["layer1"], num_heads=num_heads, return_attn=False)
        h = translayer_orig(h, tp["layer2"], num_heads=num_heads, return_attn=False)
    else:
        h, _ = translayer_ref(h, tp["layer1"], num_heads=num_heads)
        h, _ = translayer_ref(h, tp["layer2"], num_heads=num_heads)
    hn = _layernorm(h, tp["norm_gamma"], tp["norm_beta"])
    if agg == "cls_token":
        pooled = hn[:, 0]
    elif agg == "avg":
        pooled = jnp.mean(hn, axis=1)
    else:  # 'max'
        pooled = jnp.max(hn, axis=1)
    return pooled @ tp["fc2_w"].T + tp["fc2_b"]


# -----------------------------------------------------------------------------
# Deterministic synthetic parameters (shapes match the PyTorch module).
# -----------------------------------------------------------------------------
def init_params(key, dim):
    k1, k2 = jax.random.split(key)
    bound_in = (6.0 / (3 * dim + dim)) ** 0.5
    bound_out = 1.0 / (dim ** 0.5)
    return {
        "gamma": jnp.ones((dim,), jnp.float32),
        "beta": jnp.zeros((dim,), jnp.float32),
        "in_proj_weight": jax.random.uniform(k1, (3 * dim, dim), jnp.float32,
                                             -bound_in, bound_in),
        "in_proj_bias": jnp.zeros((3 * dim,), jnp.float32),
        "out_proj_weight": jax.random.uniform(k2, (dim, dim), jnp.float32,
                                              -bound_out, bound_out),
        "out_proj_bias": jnp.zeros((dim,), jnp.float32),
    }


def init_end_params(key, outer_dim, dim, n_classes=2):
    ks = jax.random.split(key, 5)
    b1 = 1.0 / (outer_dim ** 0.5)
    b2 = 1.0 / (dim ** 0.5)
    return {
        "fc1_w": jax.random.uniform(ks[0], (dim, outer_dim), jnp.float32, -b1, b1),
        "fc1_b": jnp.zeros((dim,), jnp.float32),
        "cls_token": jax.random.normal(ks[1], (1, 1, dim), jnp.float32),
        "layer1": init_params(ks[2], dim),
        "layer2": init_params(ks[3], dim),
        "norm_gamma": jnp.ones((dim,), jnp.float32),
        "norm_beta": jnp.zeros((dim,), jnp.float32),
        "fc2_w": jax.random.uniform(ks[4], (n_classes, dim), jnp.float32, -b2, b2),
        "fc2_b": jnp.zeros((n_classes,), jnp.float32),
    }


if __name__ == "__main__":
    B, N, F_IN, D, H, NCLS = 2, 8, 16, 32, 8, 2
    key = jax.random.PRNGKey(0)
    kx, kp, kd, ke = jax.random.split(key, 4)

    # ---------------- TransLayer ('Orig') kernel check ----------------
    x = jax.random.normal(kx, (B, N, D), jnp.float32)
    params = init_params(kp, D)
    prepped = prepare_translayer_params(params, num_heads=H)   # hoisted, eager, once

    tl = jax.jit(functools.partial(translayer_orig, num_heads=H, return_attn=True))
    y, attn = tl(x, prepped)
    y = jax.block_until_ready(y)
    attn = jax.block_until_ready(attn)

    y_ref, attn_ref_vals = translayer_ref(x, params, num_heads=H, mxu_dtype=jnp.bfloat16)
    assert y.shape == (B, N, D) and attn.shape == (B, N, N)
    assert jnp.allclose(y, y_ref, atol=2e-2, rtol=2e-2), \
        f"y max abs err {float(jnp.max(jnp.abs(y - y_ref)))}"
    assert jnp.allclose(attn, attn_ref_vals, atol=2e-2, rtol=2e-2), \
        f"attn max abs err {float(jnp.max(jnp.abs(attn - attn_ref_vals)))}"

    # fast variant without the attention-weights output must match y
    tl_fast = jax.jit(functools.partial(translayer_orig, num_heads=H, return_attn=False))
    y_fast = jax.block_until_ready(tl_fast(x, prepped))
    assert jnp.allclose(y_fast, y, atol=1e-5, rtol=1e-5)

    # ---------------- Transformer_End (agg='avg', attn='Orig', add=True) ----------------
    data = jax.random.normal(kd, (B, N, F_IN), jnp.float32)
    tparams = init_end_params(ke, F_IN, D, NCLS)
    tprepped = prepare_end_params(tparams, num_heads=H)        # hoisted, eager, once

    fwd = jax.jit(functools.partial(transformer_end_forward, agg="avg",
                                    num_heads=H, use_kernel=True))
    logits = jax.block_until_ready(fwd(data, tprepped))
    logits_ref = transformer_end_forward(data, tparams, agg="avg",
                                         num_heads=H, use_kernel=False)
    assert logits.shape == (B, NCLS)
    assert bool(jnp.all(jnp.isfinite(logits)))
    assert jnp.allclose(logits, logits_ref, atol=1e-1, rtol=1e-1), \
        f"logits max abs err {float(jnp.max(jnp.abs(logits - logits_ref)))}"

    print("KERNEL_OK")
</pallas_src>

<mosaic_0001>
module attributes {stable_mosaic.version = 11 : i64} {
  func.func @attn_block_kernel(%arg0: i32, %arg1: memref<8x96xbf16, #tpu.memory_space<vmem>>, %arg2: memref<32x32xbf16, #tpu.memory_space<vmem>>, %arg3: memref<1x32xf32, #tpu.memory_space<vmem>>, %arg4: memref<8x32xf32, #tpu.memory_space<vmem>>, %arg5: memref<8x32xf32, #tpu.memory_space<vmem>>, %arg6: memref<1x8x8xf32, #tpu.memory_space<vmem>>) attributes {dimension_semantics = [#tpu.dimension_semantics<parallel>], iteration_bounds = array<i64: 2>, scalar_prefetch = 0 : i64, scratch_operands = 0 : i64, tpu.core_type = #tpu.core_type<tc>, window_params = [{transform_indices = @transform_0, window_bounds = array<i64: 8, 96>}, {pipeline_mode = #tpu.pipeline_mode<synchronous>, transform_indices = @transform_1, window_bounds = array<i64: 32, 32>}, {pipeline_mode = #tpu.pipeline_mode<synchronous>, transform_indices = @transform_2, window_bounds = array<i64: 1, 32>}, {transform_indices = @transform_3, window_bounds = array<i64: 8, 32>}, {transform_indices = @transform_4, window_bounds = array<i64: 8, 32>}, {transform_indices = @transform_5, window_bounds = array<i64: 1, 8, 8>}]} {
    %c0 = arith.constant 0 : index
    %c0_0 = arith.constant 0 : index
    %0 = vector.load %arg1[%c0, %c0_0] : memref<8x96xbf16, #tpu.memory_space<vmem>>, vector<8x96xbf16>
    %1 = vector.extract_strided_slice %0 {offsets = [0, 0], sizes = [8, 4], strides = [1, 1]} : vector<8x96xbf16> to vector<8x4xbf16>
    %2 = vector.extract_strided_slice %0 {offsets = [0, 32], sizes = [8, 4], strides = [1, 1]} : vector<8x96xbf16> to vector<8x4xbf16>
    %3 = vector.extract_strided_slice %0 {offsets = [0, 64], sizes = [8, 4], strides = [1, 1]} : vector<8x96xbf16> to vector<8x4xbf16>
    %cst = arith.constant dense<0.000000e+00> : vector<8x8xf32>
    %4 = tpu.matmul %1, %2, %cst {dimension_numbers = #tpu.dot_dimension_numbers<[1], [1], [0], [0], [0, 0, 1, 0], [], []>} : vector<8x4xbf16>, vector<8x4xbf16>, vector<8x8xf32> -> vector<8x8xf32>
    %cst_1 = arith.constant dense<0xFF800000> : vector<8xf32>
    %5 = vector.multi_reduction <maximumf>, %4, %cst_1 [1] : vector<8x8xf32> to vector<8xf32>
    %6 = vector.shape_cast %5 : vector<8xf32> to vector<8x1xf32>
    %7 = vector.broadcast %6 : vector<8x1xf32> to vector<8x8xf32>
    %8 = arith.subf %4, %7 : vector<8x8xf32>
    %9 = math.exp %8 : vector<8x8xf32>
    %cst_2 = arith.constant dense<0.000000e+00> : vector<8xf32>
    %10 = vector.multi_reduction <add>, %9, %cst_2 [1] : vector<8x8xf32> to vector<8xf32>
    %11 = vector.shape_cast %10 : vector<8xf32> to vector<8x1xf32>
    %12 = tpu.reciprocal %11 {approx = true} : vector<8x1xf32> -> vector<8x1xf32>
    %13 = vector.broadcast %12 : vector<8x1xf32> to vector<8x8xf32>
    %14 = arith.mulf %9, %13 : vector<8x8xf32>
    %15 = arith.truncf %14 : vector<8x8xf32> to vector<8x8xbf16>
    %cst_3 = arith.constant dense<0.000000e+00> : vector<8x4xf32>
    %16 = tpu.matmul %15, %3, %cst_3 {dimension_numbers = #tpu.dot_dimension_numbers<[1], [0], [0], [1], [0, 0, 1, 1], [], []>} : vector<8x8xbf16>, vector<8x4xbf16>, vector<8x4xf32> -> vector<8x4xf32>
    %17 = vector.extract_strided_slice %0 {offsets = [0, 4], sizes = [8, 4], strides = [1, 1]} : vector<8x96xbf16> to vector<8x4xbf16>
    %18 = vector.extract_strided_slice %0 {offsets = [0, 36], sizes = [8, 4], strides = [1, 1]} : vector<8x96xbf16> to vector<8x4xbf16>
    %19 = vector.extract_strided_slice %0 {offsets = [0, 68], sizes = [8, 4], strides = [1, 1]} : vector<8x96xbf16> to vector<8x4xbf16>
    %cst_4 = arith.constant dense<0.000000e+00> : vector<8x8xf32>
    %20 = tpu.matmul %17, %18, %cst_4 {dimension_numbers = #tpu.dot_dimension_numbers<[1], [1], [0], [0], [0, 0, 1, 0], [], []>} : vector<8x4xbf16>, vector<8x4xbf16>, vector<8x8xf32> -> vector<8x8xf32>
    %cst_5 = arith.constant dense<0xFF800000> : vector<8xf32>
    %21 = vector.multi_reduction <maximumf>, %20, %cst_5 [1] : vector<8x8xf32> to vector<8xf32>
    %22 = vector.shape_cast %21 : vector<8xf32> to vector<8x1xf32>
    %23 = vector.broadcast %22 : vector<8x1xf32> to vector<8x8xf32>
    %24 = arith.subf %20, %23 : vector<8x8xf32>
    %25 = math.exp %24 : vector<8x8xf32>
    %cst_6 = arith.constant dense<0.000000e+00> : vector<8xf32>
    %26 = vector.multi_reduction <add>, %25, %cst_6 [1] : vector<8x8xf32> to vector<8xf32>
    %27 = vector.shape_cast %26 : vector<8xf32> to vector<8x1xf32>
    %28 = tpu.reciprocal %27 {approx = true} : vector<8x1xf32> -> vector<8x1xf32>
    %29 = vector.broadcast %28 : vector<8x1xf32> to vector<8x8xf32>
    %30 = arith.mulf %25, %29 : vector<8x8xf32>
    %31 = arith.truncf %30 : vector<8x8xf32> to vector<8x8xbf16>
    %cst_7 = arith.constant dense<0.000000e+00> : vector<8x4xf32>
    %32 = tpu.matmul %31, %19, %cst_7 {dimension_numbers = #tpu.dot_dimension_numbers<[1], [0], [0], [1], [0, 0, 1, 1], [], []>} : vector<8x8xbf16>, vector<8x4xbf16>, vector<8x4xf32> -> vector<8x4xf32>
    %33 = arith.addf %14, %30 : vector<8x8xf32>
    %34 = vector.extract_strided_slice %0 {offsets = [0, 8], sizes = [8, 4], strides = [1, 1]} : vector<8x96xbf16> to vector<8x4xbf16>
    %35 = vector.extract_strided_slice %0 {offsets = [0, 40], sizes = [8, 4], strides = [1, 1]} : vector<8x96xbf16> to vector<8x4xbf16>
    %36 = vector.extract_strided_slice %0 {offsets = [0, 72], sizes = [8, 4], strides = [1, 1]} : vector<8x96xbf16> to vector<8x4xbf16>
    %cst_8 = arith.constant dense<0.000000e+00> : vector<8x8xf32>
    %37 = tpu.matmul %34, %35, %cst_8 {dimension_numbers = #tpu.dot_dimension_numbers<[1], [1], [0], [0], [0, 0, 1, 0], [], []>} : vector<8x4xbf16>, vector<8x4xbf16>, vector<8x8xf32> -> vector<8x8xf32>
    %cst_9 = arith.constant dense<0xFF800000> : vector<8xf32>
    %38 = vector.multi_reduction <maximumf>, %37, %cst_9 [1] : vector<8x8xf32> to vector<8xf32>
    %39 = vector.shape_cast %38 : vector<8xf32> to vector<8x1xf32>
    %40 = vector.broadcast %39 : vector<8x1xf32> to vector<8x8xf32>
    %41 = arith.subf %37, %40 : vector<8x8xf32>
    %42 = math.exp %41 : vector<8x8xf32>
    %cst_10 = arith.constant dense<0.000000e+00> : vector<8xf32>
    %43 = vector.multi_reduction <add>, %42, %cst_10 [1] : vector<8x8xf32> to vector<8xf32>
    %44 = vector.shape_cast %43 : vector<8xf32> to vector<8x1xf32>
    %45 = tpu.reciprocal %44 {approx = true} : vector<8x1xf32> -> vector<8x1xf32>
    %46 = vector.broadcast %45 : vector<8x1xf32> to vector<8x8xf32>
    %47 = arith.mulf %42, %46 : vector<8x8xf32>
    %48 = arith.truncf %47 : vector<8x8xf32> to vector<8x8xbf16>
    %cst_11 = arith.constant dense<0.000000e+00> : vector<8x4xf32>
    %49 = tpu.matmul %48, %36, %cst_11 {dimension_numbers = #tpu.dot_dimension_numbers<[1], [0], [0], [1], [0, 0, 1, 1], [], []>} : vector<8x8xbf16>, vector<8x4xbf16>, vector<8x4xf32> -> vector<8x4xf32>
    %50 = arith.addf %33, %47 : vector<8x8xf32>
    %51 = vector.extract_strided_slice %0 {offsets = [0, 12], sizes = [8, 4], strides = [1, 1]} : vector<8x96xbf16> to vector<8x4xbf16>
    %52 = vector.extract_strided_slice %0 {offsets = [0, 44], sizes = [8, 4], strides = [1, 1]} : vector<8x96xbf16> to vector<8x4xbf16>
    %53 = vector.extract_strided_slice %0 {offsets = [0, 76], sizes = [8, 4], strides = [1, 1]} : vector<8x96xbf16> to vector<8x4xbf16>
    %cst_12 = arith.constant dense<0.000000e+00> : vector<8x8xf32>
    %54 = tpu.matmul %51, %52, %cst_12 {dimension_numbers = #tpu.dot_dimension_numbers<[1], [1], [0], [0], [0, 0, 1, 0], [], []>} : vector<8x4xbf16>, vector<8x4xbf16>, vector<8x8xf32> -> vector<8x8xf32>
    %cst_13 = arith.constant dense<0xFF800000> : vector<8xf32>
    %55 = vector.multi_reduction <maximumf>, %54, %cst_13 [1] : vector<8x8xf32> to vector<8xf32>
    %56 = vector.shape_cast %55 : vector<8xf32> to vector<8x1xf32>
    %57 = vector.broadcast %56 : vector<8x1xf32> to vector<8x8xf32>
    %58 = arith.subf %54, %57 : vector<8x8xf32>
    %59 = math.exp %58 : vector<8x8xf32>
    %cst_14 = arith.constant dense<0.000000e+00> : vector<8xf32>
    %60 = vector.multi_reduction <add>, %59, %cst_14 [1] : vector<8x8xf32> to vector<8xf32>
    %61 = vector.shape_cast %60 : vector<8xf32> to vector<8x1xf32>
    %62 = tpu.reciprocal %61 {approx = true} : vector<8x1xf32> -> vector<8x1xf32>
    %63 = vector.broadcast %62 : vector<8x1xf32> to vector<8x8xf32>
    %64 = arith.mulf %59, %63 : vector<8x8xf32>
    %65 = arith.truncf %64 : vector<8x8xf32> to vector<8x8xbf16>
    %cst_15 = arith.constant dense<0.000000e+00> : vector<8x4xf32>
    %66 = tpu.matmul %65, %53, %cst_15 {dimension_numbers = #tpu.dot_dimension_numbers<[1], [0], [0], [1], [0, 0, 1, 1], [], []>} : vector<8x8xbf16>, vector<8x4xbf16>, vector<8x4xf32> -> vector<8x4xf32>
    %67 = arith.addf %50, %64 : vector<8x8xf32>
    %68 = vector.extract_strided_slice %0 {offsets = [0, 16], sizes = [8, 4], strides = [1, 1]} : vector<8x96xbf16> to vector<8x4xbf16>
    %69 = vector.extract_strided_slice %0 {offsets = [0, 48], sizes = [8, 4], strides = [1, 1]} : vector<8x96xbf16> to vector<8x4xbf16>
    %70 = vector.extract_strided_slice %0 {offsets = [0, 80], sizes = [8, 4], strides = [1, 1]} : vector<8x96xbf16> to vector<8x4xbf16>
    %cst_16 = arith.constant dense<0.000000e+00> : vector<8x8xf32>
    %71 = tpu.matmul %68, %69, %cst_16 {dimension_numbers = #tpu.dot_dimension_numbers<[1], [1], [0], [0], [0, 0, 1, 0], [], []>} : vector<8x4xbf16>, vector<8x4xbf16>, vector<8x8xf32> -> vector<8x8xf32>
    %cst_17 = arith.constant dense<0xFF800000> : vector<8xf32>
    %72 = vector.multi_reduction <maximumf>, %71, %cst_17 [1] : vector<8x8xf32> to vector<8xf32>
    %73 = vector.shape_cast %72 : vector<8xf32> to vector<8x1xf32>
    %74 = vector.broadcast %73 : vector<8x1xf32> to vector<8x8xf32>
    %75 = arith.subf %71, %74 : vector<8x8xf32>
    %76 = math.exp %75 : vector<8x8xf32>
    %cst_18 = arith.constant dense<0.000000e+00> : vector<8xf32>
    %77 = vector.multi_reduction <add>, %76, %cst_18 [1] : vector<8x8xf32> to vector<8xf32>
    %78 = vector.shape_cast %77 : vector<8xf32> to vector<8x1xf32>
    %79 = tpu.reciprocal %78 {approx = true} : vector<8x1xf32> -> vector<8x1xf32>
    %80 = vector.broadcast %79 : vector<8x1xf32> to vector<8x8xf32>
    %81 = arith.mulf %76, %80 : vector<8x8xf32>
    %82 = arith.truncf %81 : vector<8x8xf32> to vector<8x8xbf16>
    %cst_19 = arith.constant dense<0.000000e+00> : vector<8x4xf32>
    %83 = tpu.matmul %82, %70, %cst_19 {dimension_numbers = #tpu.dot_dimension_numbers<[1], [0], [0], [1], [0, 0, 1, 1], [], []>} : vector<8x8xbf16>, vector<8x4xbf16>, vector<8x4xf32> -> vector<8x4xf32>
    %84 = arith.addf %67, %81 : vector<8x8xf32>
    %85 = vector.extract_strided_slice %0 {offsets = [0, 20], sizes = [8, 4], strides = [1, 1]} : vector<8x96xbf16> to vector<8x4xbf16>
    %86 = vector.extract_strided_slice %0 {offsets = [0, 52], sizes = [8, 4], strides = [1, 1]} : vector<8x96xbf16> to vector<8x4xbf16>
    %87 = vector.extract_strided_slice %0 {offsets = [0, 84], sizes = [8, 4], strides = [1, 1]} : vector<8x96xbf16> to vector<8x4xbf16>
    %cst_20 = arith.constant dense<0.000000e+00> : vector<8x8xf32>
    %88 = tpu.matmul %85, %86, %cst_20 {dimension_numbers = #tpu.dot_dimension_numbers<[1], [1], [0], [0], [0, 0, 1, 0], [], []>} : vector<8x4xbf16>, vector<8x4xbf16>, vector<8x8xf32> -> vector<8x8xf32>
    %cst_21 = arith.constant dense<0xFF800000> : vector<8xf32>
    %89 = vector.multi_reduction <maximumf>, %88, %cst_21 [1] : vector<8x8xf32> to vector<8xf32>
    %90 = vector.shape_cast %89 : vector<8xf32> to vector<8x1xf32>
    %91 = vector.broadcast %90 : vector<8x1xf32> to vector<8x8xf32>
    %92 = arith.subf %88, %91 : vector<8x8xf32>
    %93 = math.exp %92 : vector<8x8xf32>
    %cst_22 = arith.constant dense<0.000000e+00> : vector<8xf32>
    %94 = vector.multi_reduction <add>, %93, %cst_22 [1] : vector<8x8xf32> to vector<8xf32>
    %95 = vector.shape_cast %94 : vector<8xf32> to vector<8x1xf32>
    %96 = tpu.reciprocal %95 {approx = true} : vector<8x1xf32> -> vector<8x1xf32>
    %97 = vector.broadcast %96 : vector<8x1xf32> to vector<8x8xf32>
    %98 = arith.mulf %93, %97 : vector<8x8xf32>
    %99 = arith.truncf %98 : vector<8x8xf32> to vector<8x8xbf16>
    %cst_23 = arith.constant dense<0.000000e+00> : vector<8x4xf32>
    %100 = tpu.matmul %99, %87, %cst_23 {dimension_numbers = #tpu.dot_dimension_numbers<[1], [0], [0], [1], [0, 0, 1, 1], [], []>} : vector<8x8xbf16>, vector<8x4xbf16>, vector<8x4xf32> -> vector<8x4xf32>
    %101 = arith.addf %84, %98 : vector<8x8xf32>
    %102 = vector.extract_strided_slice %0 {offsets = [0, 24], sizes = [8, 4], strides = [1, 1]} : vector<8x96xbf16> to vector<8x4xbf16>
    %103 = vector.extract_strided_slice %0 {offsets = [0, 56], sizes = [8, 4], strides = [1, 1]} : vector<8x96xbf16> to vector<8x4xbf16>
    %104 = vector.extract_strided_slice %0 {offsets = [0, 88], sizes = [8, 4], strides = [1, 1]} : vector<8x96xbf16> to vector<8x4xbf16>
    %cst_24 = arith.constant dense<0.000000e+00> : vector<8x8xf32>
    %105 = tpu.matmul %102, %103, %cst_24 {dimension_numbers = #tpu.dot_dimension_numbers<[1], [1], [0], [0], [0, 0, 1, 0], [], []>} : vector<8x4xbf16>, vector<8x4xbf16>, vector<8x8xf32> -> vector<8x8xf32>
    %cst_25 = arith.constant dense<0xFF800000> : vector<8xf32>
    %106 = vector.multi_reduction <maximumf>, %105, %cst_25 [1] : vector<8x8xf32> to vector<8xf32>
    %107 = vector.shape_cast %106 : vector<8xf32> to vector<8x1xf32>
    %108 = vector.broadcast %107 : vector<8x1xf32> to vector<8x8xf32>
    %109 = arith.subf %105, %108 : vector<8x8xf32>
    %110 = math.exp %109 : vector<8x8xf32>
    %cst_26 = arith.constant dense<0.000000e+00> : vector<8xf32>
    %111 = vector.multi_reduction <add>, %110, %cst_26 [1] : vector<8x8xf32> to vector<8xf32>
    %112 = vector.shape_cast %111 : vector<8xf32> to vector<8x1xf32>
    %113 = tpu.reciprocal %112 {approx = true} : vector<8x1xf32> -> vector<8x1xf32>
    %114 = vector.broadcast %113 : vector<8x1xf32> to vector<8x8xf32>
    %115 = arith.mulf %110, %114 : vector<8x8xf32>
    %116 = arith.truncf %115 : vector<8x8xf32> to vector<8x8xbf16>
    %cst_27 = arith.constant dense<0.000000e+00> : vector<8x4xf32>
    %117 = tpu.matmul %116, %104, %cst_27 {dimension_numbers = #tpu.dot_dimension_numbers<[1], [0], [0], [1], [0, 0, 1, 1], [], []>} : vector<8x8xbf16>, vector<8x4xbf16>, vector<8x4xf32> -> vector<8x4xf32>
    %118 = arith.addf %101, %115 : vector<8x8xf32>
    %119 = vector.extract_strided_slice %0 {offsets = [0, 28], sizes = [8, 4], strides = [1, 1]} : vector<8x96xbf16> to vector<8x4xbf16>
    %120 = vector.extract_strided_slice %0 {offsets = [0, 60], sizes = [8, 4], strides = [1, 1]} : vector<8x96xbf16> to vector<8x4xbf16>
    %121 = vector.extract_strided_slice %0 {offsets = [0, 92], sizes = [8, 4], strides = [1, 1]} : vector<8x96xbf16> to vector<8x4xbf16>
    %cst_28 = arith.constant dense<0.000000e+00> : vector<8x8xf32>
    %122 = tpu.matmul %119, %120, %cst_28 {dimension_numbers = #tpu.dot_dimension_numbers<[1], [1], [0], [0], [0, 0, 1, 0], [], []>} : vector<8x4xbf16>, vector<8x4xbf16>, vector<8x8xf32> -> vector<8x8xf32>
    %cst_29 = arith.constant dense<0xFF800000> : vector<8xf32>
    %123 = vector.multi_reduction <maximumf>, %122, %cst_29 [1] : vector<8x8xf32> to vector<8xf32>
    %124 = vector.shape_cast %123 : vector<8xf32> to vector<8x1xf32>
    %125 = vector.broadcast %124 : vector<8x1xf32> to vector<8x8xf32>
    %126 = arith.subf %122, %125 : vector<8x8xf32>
    %127 = math.exp %126 : vector<8x8xf32>
    %cst_30 = arith.constant dense<0.000000e+00> : vector<8xf32>
    %128 = vector.multi_reduction <add>, %127, %cst_30 [1] : vector<8x8xf32> to vector<8xf32>
    %129 = vector.shape_cast %128 : vector<8xf32> to vector<8x1xf32>
    %130 = tpu.reciprocal %129 {approx = true} : vector<8x1xf32> -> vector<8x1xf32>
    %131 = vector.broadcast %130 : vector<8x1xf32> to vector<8x8xf32>
    %132 = arith.mulf %127, %131 : vector<8x8xf32>
    %133 = arith.truncf %132 : vector<8x8xf32> to vector<8x8xbf16>
    %cst_31 = arith.constant dense<0.000000e+00> : vector<8x4xf32>
    %134 = tpu.matmul %133, %121, %cst_31 {dimension_numbers = #tpu.dot_dimension_numbers<[1], [0], [0], [1], [0, 0, 1, 1], [], []>} : vector<8x8xbf16>, vector<8x4xbf16>, vector<8x4xf32> -> vector<8x4xf32>
    %135 = arith.addf %118, %132 : vector<8x8xf32>
    %136 = tpu.concatenate %16, %32, %49, %66, %83, %100, %117, %134 in 1 : vector<8x4xf32>, vector<8x4xf32>, vector<8x4xf32>, vector<8x4xf32>, vector<8x4xf32>, vector<8x4xf32>, vector<8x4xf32>, vector<8x4xf32> -> vector<8x32xf32>
    %137 = arith.truncf %136 : vector<8x32xf32> to vector<8x32xbf16>
    %c0_32 = arith.constant 0 : index
    %c0_33 = arith.constant 0 : index
    %138 = vector.load %arg2[%c0_32, %c0_33] : memref<32x32xbf16, #tpu.memory_space<vmem>>, vector<32x32xbf16>
    %cst_34 = arith.constant dense<0.000000e+00> : vector<8x32xf32>
    %139 = tpu.matmul %137, %138, %cst_34 {dimension_numbers = #tpu.dot_dimension_numbers<[1], [0], [0], [1], [0, 0, 1, 1], [], []>} : vector<8x32xbf16>, vector<32x32xbf16>, vector<8x32xf32> -> vector<8x32xf32>
    %c0_35 = arith.constant 0 : index
    %c0_36 = arith.constant 0 : index
    %140 = vector.load %arg4[%c0_35, %c0_36] : memref<8x32xf32, #tpu.memory_space<vmem>>, vector<8x32xf32>
    %141 = arith.addf %140, %139 : vector<8x32xf32>
    %c0_37 = arith.constant 0 : index
    %c0_38 = arith.constant 0 : index
    %142 = vector.load %arg3[%c0_37, %c0_38] : memref<1x32xf32, #tpu.memory_space<vmem>>, vector<1x32xf32>
    %143 = vector.broadcast %142 : vector<1x32xf32> to vector<8x32xf32>
    %144 = arith.addf %141, %143 : vector<8x32xf32>
    %c0_39 = arith.constant 0 : index
    %c0_40 = arith.constant 0 : index
    %145 = vector.load %arg5[%c0_39, %c0_40] : memref<8x32xf32, #tpu.memory_space<vmem>>, vector<8x32xf32>
    tpu.vector_store %arg5[%c0_39, %c0_40], %144 {strides = array<i32>} : memref<8x32xf32, #tpu.memory_space<vmem>>, vector<8x32xf32>,
    %cst_41 = arith.constant 1.250000e-01 : f32
    %146 = vector.broadcast %cst_41 : f32 to vector<8x8xf32>
    %147 = arith.mulf %135, %146 : vector<8x8xf32>
    %c0_42 = arith.constant 0 : index
    %c0_43 = arith.constant 0 : index
    %c0_44 = arith.constant 0 : index
    %148 = vector.load %arg6[%c0_42, %c0_43, %c0_44] : memref<1x8x8xf32, #tpu.memory_space<vmem>>, vector<1x8x8xf32>
    %149 = vector.shape_cast %148 : vector<1x8x8xf32> to vector<8x8xf32>
    %150 = vector.shape_cast %147 : vector<8x8xf32> to vector<1x8x8xf32>
    tpu.vector_store %arg6[%c0_42, %c0_43, %c0_44], %150 {strides = array<i32>} : memref<1x8x8xf32, #tpu.memory_space<vmem>>, vector<1x8x8xf32>,
    return
  }
  func.func @transform_0(%arg0: i32) -> (i32, i32) {
    %c0_i32 = arith.constant 0 : i32
    %c0_i32_0 = arith.constant 0 : i32
    return %arg0, %c0_i32 : i32, i32
  }
  func.func @transform_1(%arg0: i32) -> (i32, i32) {
    %c0_i32 = arith.constant 0 : i32
    %c0_i32_0 = arith.constant 0 : i32
    %c0_i32_1 = arith.constant 0 : i32
    return %c0_i32, %c0_i32_0 : i32, i32
  }
  func.func @transform_2(%arg0: i32) -> (i32, i32) {
    %c0_i32 = arith.constant 0 : i32
    %c0_i32_0 = arith.constant 0 : i32
    %c0_i32_1 = arith.constant 0 : i32
    return %c0_i32, %c0_i32_0 : i32, i32
  }
  func.func @transform_3(%arg0: i32) -> (i32, i32) {
    %c0_i32 = arith.constant 0 : i32
    %c0_i32_0 = arith.constant 0 : i32
    return %arg0, %c0_i32 : i32, i32
  }
  func.func @transform_4(%arg0: i32) -> (i32, i32) {
    %c0_i32 = arith.constant 0 : i32
    %c0_i32_0 = arith.constant 0 : i32
    return %arg0, %c0_i32 : i32, i32
  }
  func.func @transform_5(%arg0: i32) -> (i32, i32, i32) {
    %c0_i32 = arith.constant 0 : i32
    %c0_i32_0 = arith.constant 0 : i32
    %c0_i32_1 = arith.constant 0 : i32
    return %arg0, %c0_i32, %c0_i32_0 : i32, i32, i32
  }
}

module attributes {stable_mosaic.version = 11 : i64} {
  func.func @ln_qkv_kernel(%arg0: i32, %arg1: memref<16x32xf32, #tpu.memory_space<vmem>>, %arg2: memref<1x32xf32, #tpu.memory_space<vmem>>, %arg3: memref<1x32xf32, #tpu.memory_space<vmem>>, %arg4: memref<32x96xbf16, #tpu.memory_space<vmem>>, %arg5: memref<1x96xf32, #tpu.memory_space<vmem>>, %arg6: memref<16x96xbf16, #tpu.memory_space<vmem>>) attributes {dimension_semantics = [#tpu.dimension_semantics<parallel>], iteration_bounds = array<i64: 1>, scalar_prefetch = 0 : i64, scratch_operands = 0 : i64, tpu.core_type = #tpu.core_type<tc>, window_params = [{transform_indices = @transform_0, window_bounds = array<i64: 16, 32>}, {pipeline_mode = #tpu.pipeline_mode<synchronous>, transform_indices = @transform_1, window_bounds = array<i64: 1, 32>}, {pipeline_mode = #tpu.pipeline_mode<synchronous>, transform_indices = @transform_2, window_bounds = array<i64: 1, 32>}, {pipeline_mode = #tpu.pipeline_mode<synchronous>, transform_indices = @transform_3, window_bounds = array<i64: 32, 96>}, {pipeline_mode = #tpu.pipeline_mode<synchronous>, transform_indices = @transform_4, window_bounds = array<i64: 1, 96>}, {transform_indices = @transform_5, window_bounds = array<i64: 16, 96>}]} {
    %c0 = arith.constant 0 : index
    %c0_0 = arith.constant 0 : index
    %0 = vector.load %arg1[%c0, %c0_0] : memref<16x32xf32, #tpu.memory_space<vmem>>, vector<16x32xf32>
    %cst = arith.constant dense<0.000000e+00> : vector<16xf32>
    %1 = vector.multi_reduction <add>, %0, %cst [1] : vector<16x32xf32> to vector<16xf32>
    %2 = vector.shape_cast %1 : vector<16xf32> to vector<16x1xf32>
    %cst_1 = arith.constant 3.200000e+01 : f32
    %3 = vector.broadcast %cst_1 : f32 to vector<16x1xf32>
    %4 = arith.divf %2, %3 : vector<16x1xf32>
    %5 = vector.broadcast %4 : vector<16x1xf32> to vector<16x32xf32>
    %6 = arith.subf %0, %5 : vector<16x32xf32>
    %7 = arith.mulf %6, %6 : vector<16x32xf32>
    %cst_2 = arith.constant dense<0.000000e+00> : vector<16xf32>
    %8 = vector.multi_reduction <add>, %7, %cst_2 [1] : vector<16x32xf32> to vector<16xf32>
    %9 = vector.shape_cast %8 : vector<16xf32> to vector<16x1xf32>
    %cst_3 = arith.constant 3.200000e+01 : f32
    %10 = vector.broadcast %cst_3 : f32 to vector<16x1xf32>
    %11 = arith.divf %9, %10 : vector<16x1xf32>
    %12 = vector.broadcast %4 : vector<16x1xf32> to vector<16x32xf32>
    %13 = arith.subf %0, %12 : vector<16x32xf32>
    %cst_4 = arith.constant 9.99999974E-6 : f32
    %14 = vector.broadcast %cst_4 : f32 to vector<16x1xf32>
    %15 = arith.addf %11, %14 : vector<16x1xf32>
    %16 = math.rsqrt %15 : vector<16x1xf32>
    %17 = vector.broadcast %16 : vector<16x1xf32> to vector<16x32xf32>
    %18 = arith.mulf %13, %17 : vector<16x32xf32>
    %c0_5 = arith.constant 0 : index
    %c0_6 = arith.constant 0 : index
    %19 = vector.load %arg2[%c0_5, %c0_6] : memref<1x32xf32, #tpu.memory_space<vmem>>, vector<1x32xf32>
    %20 = vector.broadcast %19 : vector<1x32xf32> to vector<16x32xf32>
    %21 = arith.mulf %18, %20 : vector<16x32xf32>
    %c0_7 = arith.constant 0 : index
    %c0_8 = arith.constant 0 : index
    %22 = vector.load %arg3[%c0_7, %c0_8] : memref<1x32xf32, #tpu.memory_space<vmem>>, vector<1x32xf32>
    %23 = vector.broadcast %22 : vector<1x32xf32> to vector<16x32xf32>
    %24 = arith.addf %21, %23 : vector<16x32xf32>
    %25 = arith.truncf %24 : vector<16x32xf32> to vector<16x32xbf16>
    %c0_9 = arith.constant 0 : index
    %c0_10 = arith.constant 0 : index
    %26 = vector.load %arg4[%c0_9, %c0_10] : memref<32x96xbf16, #tpu.memory_space<vmem>>, vector<32x96xbf16>
    %cst_11 = arith.constant dense<0.000000e+00> : vector<16x96xf32>
    %27 = tpu.matmul %25, %26, %cst_11 {dimension_numbers = #tpu.dot_dimension_numbers<[1], [0], [0], [1], [0, 0, 1, 1], [], []>} : vector<16x32xbf16>, vector<32x96xbf16>, vector<16x96xf32> -> vector<16x96xf32>
    %c0_12 = arith.constant 0 : index
    %c0_13 = arith.constant 0 : index
    %28 = vector.load %arg5[%c0_12, %c0_13] : memref<1x96xf32, #tpu.memory_space<vmem>>, vector<1x96xf32>
    %29 = vector.broadcast %28 : vector<1x96xf32> to vector<16x96xf32>
    %30 = arith.addf %27, %29 : vector<16x96xf32>
    %31 = arith.truncf %30 : vector<16x96xf32> to vector<16x96xbf16>
    %c0_14 = arith.constant 0 : index
    %c0_15 = arith.constant 0 : index
    %32 = vector.load %arg6[%c0_14, %c0_15] : memref<16x96xbf16, #tpu.memory_space<vmem>>, vector<16x96xbf16>
    tpu.vector_store %arg6[%c0_14, %c0_15], %31 {strides = array<i32>} : memref<16x96xbf16, #tpu.memory_space<vmem>>, vector<16x96xbf16>,
    return
  }
  func.func @transform_0(%arg0: i32) -> (i32, i32) {
    %c0_i32 = arith.constant 0 : i32
    %c0_i32_0 = arith.constant 0 : i32
    return %arg0, %c0_i32 : i32, i32
  }
  func.func @transform_1(%arg0: i32) -> (i32, i32) {
    %c0_i32 = arith.constant 0 : i32
    %c0_i32_0 = arith.constant 0 : i32
    %c0_i32_1 = arith.constant 0 : i32
    return %c0_i32, %c0_i32_0 : i32, i32
  }
  func.func @transform_2(%arg0: i32) -> (i32, i32) {
    %c0_i32 = arith.constant 0 : i32
    %c0_i32_0 = arith.constant 0 : i32
    %c0_i32_1 = arith.constant 0 : i32
    return %c0_i32, %c0_i32_0 : i32, i32
  }
  func.func @transform_3(%arg0: i32) -> (i32, i32) {
    %c0_i32 = arith.constant 0 : i32
    %c0_i32_0 = arith.constant 0 : i32
    %c0_i32_1 = arith.constant 0 : i32
    return %c0_i32, %c0_i32_0 : i32, i32
  }
  func.func @transform_4(%arg0: i32) -> (i32, i32) {
    %c0_i32 = arith.constant 0 : i32
    %c0_i32_0 = arith.constant 0 : i32
    %c0_i32_1 = arith.constant 0 : i32
    return %c0_i32, %c0_i32_0 : i32, i32
  }
  func.func @transform_5(%arg0: i32) -> (i32, i32) {
    %c0_i32 = arith.constant 0 : i32
    %c0_i32_0 = arith.constant 0 : i32
    return %arg0, %c0_i32 : i32, i32
  }
}

</mosaic_0001>

<bundles_post_ra>
// kernel: translayer_orig.2
= control target key start
LH: loop header
LB: loop body
LE: loop exit
PB: predicated region body
PF: predicated region fallthrough
CT: control target
= control target key end

     0   :  { %10 = vsyncpa [#allocation3], 0  ;;  %s541_s0 = inlined_call_operand.hbm [shape: f32[16,32], index: 0, kind: input, shape index: {}]   ;;  %s542_s1 = inlined_call_operand.hbm [shape: f32[1,32], index: 1, kind: input, shape index: {}]   ;;  %s543_s2 = inlined_call_operand.hbm [shape: f32[1,32], index: 2, kind: input, shape index: {}]   ;;  %s544_s3 = inlined_call_operand.hbm [shape: bf16[32,96], index: 3, kind: input, shape index: {}]   ;;  %s545_s4 = inlined_call_operand.hbm [shape: f32[1,96], index: 4, kind: input, shape index: {}]   ;;  %s546_s5 = inlined_call_operand.hbm [shape: bf16[16,96], index: 5, kind: output, shape index: {}]  }
   0x1   :  { %11 = vsyncpa [#allocation6], 0 }
   0x2   :  { %12 = vsyncpa [#allocation9], 0 }
   0x3   :  { %13 = vsyncpa [#allocation4], 0  ;;  %s409_s18 = smov [#allocation5]   ;;  %s410_s20 = smov [#allocation8]  }
   0x4   :  { %s32_s19 = sshll.u32 %s409_s18, 4  ;;  %s51_s21 = sshll.u32 %s410_s20, 4  ;;  %s33_s19 = int_to_ptr.vmem [resolvable:$true] %s32_s19  ;;  %s451_s21 = int_to_ptr.vmem [resolvable:$true] %s51_s21 }
   0x5   :  { %s269_s24 = scalar_lea.hbm %s542_s1, 16 }
   0x6   :  { %p270_p0 = scmp.ne.s32.totalorder %s542_s1, %s269_s24  ;;  %p273_p1 = scmp.lt.u32.totalorder %s269_s24, %s542_s1 }
   0x8   :  { %p275_p2 = pnand %p273_p1, %p270_p0 }
   0xa   :  { %278 = shalt.err (!%p275_p2)
}
   0xb   :  { %s279_s29 = scalar_lea.vmem %s33_s19, 16  ;;  %s283_s30 = scalar_lea.vmem %s33_s19, 32 }
   0xc   :  { %p280_p3 = scmp.ne.s32.totalorder %s33_s19, %s279_s29  ;;  %p284_p4 = scmp.lt.s32.totalorder %s33_s19, %s33_s19 }
   0xd   :  { %p285_p5 = scmp.lt.s32.totalorder %s283_s30, %s279_s29 }
   0xf   :  { %p286_p6 = por %p285_p5, %p284_p4 }
  0x11   :  { %p287_p7 = pnand %p286_p6, %p280_p3 }
  0x13   :  { %290 = shalt.err (!%p287_p7)
}
  0x14   :  { %35 = dma.hbm_to_vmem [thread:$0]  %s542_s1, 16, %s33_s19, [#allocation6]  }
  0x15   :  { %s291_s10 = scalar_lea.hbm %s544_s3, 256 }
  0x16   :  { %p292_p8 = scmp.ne.s32.totalorder %s544_s3, %s291_s10  ;;  %p295_p9 = scmp.lt.u32.totalorder %s291_s10, %s544_s3 }
  0x18   :  { %p297_p10 = pnand %p295_p9, %p292_p8 }
  0x1a   :  { %300 = shalt.err (!%p297_p10)
}
  0x1b   :  { %s301_s15 = scalar_lea.vmem %s451_s21, 256  ;;  %p306_p12 = scmp.lt.s32.totalorder %s451_s21, %s451_s21 }
  0x1c   :  { %p302_p11 = scmp.ne.s32.totalorder %s451_s21, %s301_s15  ;;  %p307_p13 = scmp.lt.s32.totalorder %s301_s15, %s301_s15 }
  0x1e   :  { %p308_p0 = por %p307_p13, %p306_p12 }
  0x20   :  { %p309_p1 = pnand %p308_p0, %p302_p11 }
  0x22   :  { %312 = shalt.err (!%p309_p1)
}
  0x23   :  { %s411_s1 = smov 64   ;;  %s412_s16 = smov 4  }
  0x24   :  { %57 = dma.hbm_to_vmem [thread:$0]  %s544_s3, 256, %s451_s21, [#allocation9], %s411_s1, %s411_s1, %s412_s16  }
  0x25   :  { %s413_s19 = smov [#allocation2]   ;;  %s313_s24 = scalar_lea.hbm %s541_s0, 256 }
  0x26   :  { %s19_s20 = sshll.u32 %s413_s19, 4  ;;  %p314_p2 = scmp.ne.s32.totalorder %s541_s0, %s313_s24  ;;  %s20_s20 = int_to_ptr.vmem [resolvable:$true] %s19_s20 }
  0x27   :  { %p317_p3 = scmp.lt.u32.totalorder %s313_s24, %s541_s0 }
  0x29   :  { %p319_p4 = pnand %p317_p3, %p314_p2 }
  0x2b   :  { %322 = shalt.err (!%p319_p4)
}
  0x2c   :  { %s323_s29 = scalar_lea.vmem %s20_s20, 256  ;;  %p328_p6 = scmp.lt.s32.totalorder %s20_s20, %s20_s20 }
  0x2d   :  { %p324_p5 = scmp.ne.s32.totalorder %s20_s20, %s323_s29  ;;  %p329_p7 = scmp.lt.s32.totalorder %s323_s29, %s323_s29 }
  0x2f   :  { %p330_p8 = por %p329_p7, %p328_p6 }
  0x31   :  { %p331_p9 = pnand %p330_p8, %p324_p5 }
  0x33   :  { %334 = shalt.err (!%p331_p9)
}
  0x34   :  { %s414_s3 = smov 128   ;;  %s415_s21 = smov 8  }
  0x35   :  { %25 = dma.hbm_to_vmem [thread:$0]  %s541_s0, 256, %s20_s20, [#allocation3], %s414_s3, %s414_s3, %s415_s21  }
  0x36   :  { %s416_s7 = smov [#allocation7]   ;;  %s417_s9 = smov [#allocation10]  }
  0x37   :  { %s42_s8 = sshll.u32 %s416_s7, 4  ;;  %s64_s10 = sshll.u32 %s417_s9, 4  ;;  %s43_s8 = int_to_ptr.vmem [resolvable:$true] %s42_s8  ;;  %s65_s10 = int_to_ptr.vmem [resolvable:$true] %s64_s10 }
  0x38   :  { %s335_s13 = scalar_lea.hbm %s543_s2, 16 }
  0x39   :  { %p336_p10 = scmp.ne.s32.totalorder %s543_s2, %s335_s13  ;;  %p339_p11 = scmp.lt.u32.totalorder %s335_s13, %s543_s2 }
  0x3b   :  { %p341_p12 = pnand %p339_p11, %p336_p10 }
  0x3d   :  { %344 = shalt.err (!%p341_p12)
}
  0x3e   :  { %s345_s0 = scalar_lea.vmem %s43_s8, 16  ;;  %s349_s19 = scalar_lea.vmem %s43_s8, 32 }
  0x3f   :  { %p346_p13 = scmp.ne.s32.totalorder %s43_s8, %s345_s0  ;;  %p350_p0 = scmp.lt.s32.totalorder %s43_s8, %s43_s8 }
  0x40   :  { %p351_p1 = scmp.lt.s32.totalorder %s349_s19, %s345_s0 }
  0x42   :  { %p352_p2 = por %p351_p1, %p350_p0 }
  0x44   :  { %p353_p3 = pnand %p352_p2, %p346_p13 }
  0x46   :  { %356 = shalt.err (!%p353_p3)
}
  0x47   :  { %45 = dma.hbm_to_vmem [thread:$0]  %s543_s2, 16, %s43_s8, [#allocation6]  }
  0x48   :  { %s357_s25 = scalar_lea.hbm %s545_s4, 16 }
  0x49   :  { %p358_p4 = scmp.ne.s32.totalorder %s545_s4, %s357_s25  ;;  %p361_p5 = scmp.lt.u32.totalorder %s357_s25, %s545_s4 }
  0x4b   :  { %p363_p6 = pnand %p361_p5, %p358_p4 }
  0x4d   :  { %366 = shalt.err (!%p363_p6)
}
  0x4e   :  { %s367_s3 = scalar_lea.vmem %s65_s10, 16  ;;  %s371_s21 = scalar_lea.vmem %s65_s10, 32 }
  0x4f   :  { %p368_p7 = scmp.ne.s32.totalorder %s65_s10, %s367_s3  ;;  %p372_p8 = scmp.lt.s32.totalorder %s65_s10, %s65_s10 }
  0x50   :  { %p373_p9 = scmp.lt.s32.totalorder %s371_s21, %s367_s3 }
  0x52   :  { %p374_p10 = por %p373_p9, %p372_p8 }
  0x54   :  { %p375_p11 = pnand %p374_p10, %p368_p7 }
  0x56   :  { %378 = shalt.err (!%p375_p11)
}
  0x57   :  { %67 = dma.hbm_to_vmem [thread:$0]  %s545_s4, 16, %s65_s10, [#allocation9]  }
  0x58   :  { %401 = dma.done.wait [#allocation3], 256  }
  0x59   :  { %402 = vsyncadd [#allocation3], 4294967040 }
  0x5a   :  { %403 = dma.done.wait [#allocation6], 32  }
  0x5b   :  { %404 = vsyncadd [#allocation6], 4294967264 }
  0x5c   :  { %405 = dma.done.wait [#allocation9], 272  }
  0x5d   :  { %406 = vsyncadd [#allocation9], 4294967024  ;;  %vm86_vm0 = vcmask 261120   ;;  %v84_v0 = vld [vmem:[#allocation2] sm:$0xff]  ;;  %v85_v1 = vld [vmem:[#allocation2 + $0x8] sm:$0xff]  ;;  %v418_v15 = vmov 0.0  }
  0x5e   :  { %v87_v2 = vsel %vm86_vm0, %v84_v0, 0.0  ;;  %v90_v3 = vsel %vm86_vm0, %v85_v1, 0.0  ;;  %v263_v14 = vld [vmem:[#allocation8] sm:$0xff]   ;;  %243 = vmatprep.subr.bf16.mxu0 %v418_v15  ;;  %v264_v16 = vld [vmem:[#allocation8 + $0x8] sm:$0xff]   ;;  %vm419_vm1 = vmmov 0   ;;  %vm208_vm2 = vcmask 781312  }
  0x5f   :  { %88 = vadd.xlane.f32.xlu0 %v87_v2  ;;  %244 = vmatpush3.bf16.msra.mxu0 %v263_v14  ;;  %v230_v25 = vld [vmem:[#allocation5] ss:$0 sm:$0xff]  ;;  %v231_v29 = vld [vmem:[#allocation7] ss:$0 sm:$0xff]  ;;  %v232_v34 = vld [vmem:[#allocation10] ss:$0 sm:$0xff] }
  0x60   :  { %247 = vmatprep.mubr.msk.bf16.mxu0 %vm419_vm1, %v418_v15  ;;  %245 = vmatprep.subr.bf16.mxu0 %v418_v15  ;;  %s420_s4 = smov [#allocation11]  }
  0x61   :  { %s216_s6 = sshll.u32 %s420_s4, 4  ;;  %s217_s6 = int_to_ptr.vmem [resolvable:$true] %s216_s6 }
  0x62   :  { %s379_s7 = scalar_lea.vmem %s217_s6, 128  ;;  %p384_p13 = scmp.lt.s32.totalorder %s217_s6, %s217_s6 }
  0x63   :  { %91 = vadd.xlane.f32.xlu0 %v90_v3  ;;  %246 = vmatpush3.bf16.msra.mxu0 %v264_v16  ;;  %p380_p12 = scmp.ne.s32.totalorder %s217_s6, %s379_s7  ;;  %p385_p0 = scmp.lt.s32.totalorder %s379_s7, %s379_s7 }
  0x65   :  { %p386_p1 = por %p385_p0, %p384_p13 }
  0x67   :  { %p387_p2 = pnand %p386_p1, %p380_p12 }
  0xec   :  { %v89_v4 = vpop.xlane.xlu0 %88 }
  0xed   :  { %v94_v5 = vmul.f32 0.03125, %v89_v4 }
  0xef   :  { %v96_v6 = vsub.f32 %v84_v0, %v94_v5 }
  0xf0   :  { %v92_v7 = vpop.xlane.xlu0 %91 }
  0xf1   :  { %v95_v8 = vmul.f32 0.03125, %v92_v7  ;;  %v98_v9 = vmul.f32 %v96_v6, %v96_v6 }
  0xf3   :  { %v97_v10 = vsub.f32 %v85_v1, %v95_v8  ;;  %v100_v11 = vsel %vm86_vm0, %v98_v9, 0.0 }
  0xf4   :  { %101 = vadd.xlane.f32.xlu1 %v100_v11 }
  0xf5   :  { %v99_v12 = vmul.f32 %v97_v10, %v97_v10 }
  0xf7   :  { %v103_v13 = vsel %vm86_vm0, %v99_v12, 0.0 }
  0xf8   :  { %104 = vadd.xlane.f32.xlu1 %v103_v13 }
 0x181   :  { %v102_v17 = vpop.xlane.xlu1 %101 }
 0x182   :  { %v106_v18 = vmul.f32 0.03125, %v102_v17 }
 0x184   :  { %v108_v19 = vadd.f32 1e-05, %v106_v18 }
 0x185   :  { %v105_v20 = vpop.xlane.xlu1 %104 }
 0x186   :  { %265 = vrsqrt.f32 %v108_v19  ;;  %v107_v21 = vmul.f32 0.03125, %v105_v20 }
 0x188   :  { %v109_v22 = vadd.f32 1e-05, %v107_v21 }
 0x18a   :  { %267 = vrsqrt.f32 %v109_v22 }
 0x190   :  { %v266_v23 = vpop.eup %265 }
 0x191   :  { %v112_v24 = vmul.f32 %v266_v23, %v96_v6 }
 0x193   :  { %v121_v28 = vmul.f32 %v230_v25, %v112_v24 }
 0x194   :  { %v268_v26 = vpop.eup %267 }
 0x195   :  { %v113_v27 = vmul.f32 %v268_v26, %v97_v10  ;;  %v130_v31 = vadd.f32 %v231_v29, %v121_v28 }
 0x197   :  { %v122_v30 = vmul.f32 %v230_v25, %v113_v27 }
 0x199   :  { %v131_v32 = vadd.f32 %v231_v29, %v122_v30 }
 0x19b   :  { %v132_v33 = vpack.c.bf16 %v131_v32, %v130_v31 }
 0x19d   :  { %248 = vmatmul.mubr.msk.bf16.vlgmr.msra.gmra.mrb[0].mxu0 %vm86_vm0, %v132_v33 }
 0x270   :  { %v193_v35 = vpop.f32.mrb[0].mxu0 }
 0x271   :  { %v194_v36 = vadd.f32 %v232_v34, %v193_v35  ;;  %v249_v37 = vpop.f32.mrb[1].mxu0 }
 0x272   :  { %v196_v38 = vpop.f32.mrb[2].mxu0 }
 0x273   :  { %v238_v39 = vpack.c.bf16 %v194_v36, %v194_v36  ;;  %v197_v40 = vadd.f32 %v232_v34, %v196_v38  ;;  %v250_v41 = vpop.f32.mrb[3].mxu0 }
 0x275   :  { %v239_v42 = vpack.c.bf16 %v197_v40, %v197_v40  ;;  %209 = vst.msk [vmem:[#allocation11] sm:$0xf] %vm208_vm2, %v238_v39 }
 0x277   :  { %210 = vst.msk [vmem:[#allocation11 + $0x4] sm:$0xf] %vm208_vm2, %v239_v42 }
 0x278   :  { %390 = shalt.err (!%p387_p2)
}
 0x279   :  { %s391_s10 = scalar_lea.hbm %s546_s5, 128 }
 0x27a   :  { %p392_p3 = scmp.ne.s32.totalorder %s546_s5, %s391_s10  ;;  %p395_p4 = scmp.lt.u32.totalorder %s391_s10, %s546_s5 }
 0x27c   :  { %p397_p5 = pnand %p395_p4, %p392_p3 }
 0x27e   :  { %400 = shalt.err (!%p397_p5)
}
 0x27f   :  { %222 = dma.vmem_to_hbm [thread:$0]  %s217_s6, 128, %s546_s5, [#allocation4], %s411_s1, %s411_s1, %s412_s16  }
 0x280   :  { %407 = dma.done.wait [#allocation4], 128  }
 0x281   :  { %408 = vsyncadd [#allocation4], 4294967168 }
 0x282   :  { %226 = vsyncpa [#allocation3], 1 }
 0x283   :  { %227 = vsyncpa [#allocation6], 1 }
 0x284   :  { %228 = vsyncpa [#allocation9], 1 }
 0x285   :  { %229 = vsyncpa [#allocation4], 1 }

// kernel: translayer_orig.3
= control target key start
LH: loop header
LB: loop body
LE: loop exit
PB: predicated region body
PF: predicated region fallthrough
CT: control target
= control target key end

     0   :  { %11 = vsyncpa [#allocation3], 0  ;;  %s2589_s0 = inlined_call_operand.hbm [shape: bf16[16,96], index: 0, kind: input, shape index: {}]   ;;  %s2590_s1 = inlined_call_operand.hbm [shape: bf16[32,32], index: 1, kind: input, shape index: {}]   ;;  %s2591_s2 = inlined_call_operand.hbm [shape: f32[1,32], index: 2, kind: input, shape index: {}]   ;;  %s2592_s3 = inlined_call_operand.hbm [shape: f32[16,32], index: 3, kind: input, shape index: {}]   ;;  %s2593_s4 = inlined_call_operand.hbm [shape: f32[16,32], index: 4, kind: output, shape index: {0}]   ;;  %s2594_s5 = inlined_call_operand.hbm [shape: f32[2,8,8], index: 5, kind: output, shape index: {1}]  }
   0x1   :  { %13 = vsyncpa [#allocation3 + $0x1], 0 }
   0x2   :  { %14 = vsyncpa [#allocation6], 0 }
   0x3   :  { %15 = vsyncpa [#allocation9], 0 }
   0x4   :  { %17 = vsyncpa [#allocation9 + $0x1], 0 }
   0x5   :  { %18 = vsyncpa [#allocation4], 0 }
   0x6   :  { %20 = vsyncpa [#allocation4 + $0x1], 0 }
   0x7   :  { %21 = vsyncpa [#allocation12], 0 }
   0x8   :  { %23 = vsyncpa [#allocation12 + $0x1], 0  ;;  %s2120_s18 = smov 0   ;;  %s2122_s19 = smov 0  }
   0x9   :  { %s2124_s20 = smov 0   ;;  %s2126_s21 = smov 0  }
   0xa LB: > { %s2141_s22 = sadd.s32 4294967295, %s2048_s21   ;;  %s1498_s23 = sadd.s32 4294967294, %s2048_s21   ;;  %s2048_s21 = sphi %s2126_s21, %s2616_s21   ;;  %s2044_s20 = sphi %s2124_s20, %s2615_s20   ;;  %s2040_s19 = sphi %s2122_s19, %s2614_s19   ;;  %s2036_s18 = sphi %s2120_s18, %s2613_s18  }
   0xb   : > { %p49_p0 = scmp.ne.s32.totalorder %s2040_s19, %s2036_s18  ;;  %p2595_p1 = scmp.eq.s32.totalorder %s2141_s22, 0 }
   0xc   : > { %p147_p3 = scmp.eq.s32.totalorder %s1498_s23, 1  ;;  %p1499_p5 = scmp.ge.s32.totalorder %s2048_s21, 1 }
   0xd   : > { %p2150_p4 = por %p2595_p1, %p49_p0  ;;  %p180_p7 = scmp.lt.s32.totalorder %s2048_s21, 3 }
   0xe   : > { %p2155_p6 = por %p147_p3, %p49_p0  ;;  %s2050_s27 = smov [#allocation5]  }
   0xf   : > { %s2599_s24 = scalar_select %p2150_p4, 1, 0 }
  0x10   : > { %s2600_s25 = scalar_select %p2155_p6, 1, 0 }
  0x11   : > { %p2160_p8 = pnand %p1499_p5, %p180_p7  ;;  %s192_s28 = sshll.u32 %s2050_s27, 4  ;;  %s2164_s28 = int_to_ptr.vmem [resolvable:$true] %s192_s28 }
  0x12   : > { %s2051_s30 = smov [#allocation7]   ;;  %s1826_s9 = scalar_lea.hbm %s2590_s1, 256 }
  0x13   : > { %s2601_s26 = scalar_select %p2160_p8, 1, 0 }
  0x14   : > { %p1696_p9 = pneg %p2160_p8  ;;  %s206_s6 = sshll.u32 %s2051_s30, 4  ;;  %s2175_s6 = int_to_ptr.vmem [resolvable:$true] %s206_s6 }
  0x15   : > { %p1827_p12 = scmp.ne.s32.totalorder %s2590_s1, %s1826_s9  ;;  %p1833_p5 = scmp.lt.u32.totalorder %s1826_s9, %s2590_s1 }
  0x16   : > { %p2171_p11 = pnand %p1696_p9, %p2595_p1 }
  0x18   : > { %p1828_p13 = pneg %p2171_p11 }
  0x1a   : > { %p1829_p0 = pnand %p1828_p13, %p1827_p12 }
  0x1c   : > { %p1830_p3 = pneg %p1829_p0 }
  0x1e   : > { %p1835_p7 = pnand %p1833_p5, %p1830_p3 }
  0x20   : > { %1838 = shalt.err (!%p1835_p7)
}
  0x21   : > { %s1839_s14 = scalar_lea.vmem %s2164_s28, 256  ;;  %p1847_p2 = scmp.lt.s32.totalorder %s2164_s28, %s2164_s28 }
  0x22   : > { %p1840_p9 = scmp.ne.s32.totalorder %s2164_s28, %s1839_s14  ;;  %p1848_p12 = scmp.lt.s32.totalorder %s1839_s14, %s1839_s14 }
  0x24   : > { %p1842_p10 = pnand %p1840_p9, %p1828_p13  ;;  %p1849_p0 = por %p1848_p12, %p1847_p2 }
  0x26   : > { %p1843_p1 = pneg %p1842_p10 }
  0x28   : > { %p1850_p6 = pnand %p1849_p0, %p1843_p1 }
  0x2a   : > { %1853 = shalt.err (!%p1850_p6)
}
  0x2b   : > { %s2052_s15 = smov 64   ;;  %s2053_s16 = smov 4  }
  0x2c   : > { %1699 = dma.hbm_to_vmem [thread:$0]  (!%p2171_p11), %s2590_s1, 256, %s2164_s28, [#allocation6], %s2052_s15, %s2052_s15, %s2053_s16  }
  0x2d   : > { %s1854_s7 = scalar_lea.hbm %s2591_s2, 16 }
  0x2e   : > { %p1855_p2 = scmp.ne.s32.totalorder %s2591_s2, %s1854_s7  ;;  %p1861_p10 = scmp.lt.u32.totalorder %s1854_s7, %s2591_s2 }
  0x30   : > { %p1857_p1 = pnand %p1855_p2, %p1828_p13 }
  0x32   : > { %p1858_p6 = pneg %p1857_p1 }
  0x34   : > { %p1863_p3 = pnand %p1861_p10, %p1858_p6 }
  0x36   : > { %1866 = shalt.err (!%p1863_p3)
}
  0x37   : > { %s1867_s28 = scalar_lea.vmem %s2175_s6, 16  ;;  %s1874_s12 = scalar_lea.vmem %s2175_s6, 32 }
  0x38   : > { %p1868_p5 = scmp.ne.s32.totalorder %s2175_s6, %s1867_s28  ;;  %p1875_p12 = scmp.lt.s32.totalorder %s2175_s6, %s2175_s6 }
  0x39   : > { %p1876_p0 = scmp.lt.s32.totalorder %s1874_s12, %s1867_s28 }
  0x3a   : > { %p1870_p7 = pnand %p1868_p5, %p1828_p13 }
  0x3b   : > { %p1877_p2 = por %p1876_p0, %p1875_p12 }
  0x3c   : > { %p1871_p9 = pneg %p1870_p7 }
  0x3e   : > { %p1878_p1 = pnand %p1877_p2, %p1871_p9 }
  0x40   : > { %1881 = shalt.err (!%p1878_p1)
}
  0x41   : > { %1702 = dma.hbm_to_vmem [thread:$0]  (!%p2171_p11), %s2591_s2, 16, %s2175_s6, [#allocation6]  }
  0x42   : > { %s2231_s15 = sadd.s32 1, %s2048_s21   ;;  %s36_s29 = sadd.s32 1, %s2044_s20 }
  0x43   : > { %s33_s16 = ssub.s32 %s2048_s21, %s2231_s15  ;;  %p43_p13 = scmp.ne.s32.totalorder %s2044_s20, %s2040_s19 }
  0x44   : > { %p34_p6 = scmp.eq.s32.totalorder %s33_s16, 0  ;;  %p44_p10 = scmp.eq.s32.totalorder %s2048_s21, 0 }
  0x45   : > { %p2603_p3 = scmp.eq.s32.totalorder %s2141_s22, 1  ;;  %p1719_p7 = scmp.lt.s32.totalorder %s2048_s21, 2 }
  0x46   : > { %s2247_s23 = scalar_select %p34_p6, %s2044_s20, %s36_s29  }
  0x47   : > { %p2241_p5 = por %p2603_p3, %p43_p13  ;;  %p45_p9 = por %p44_p10, %p43_p13 }
  0x48   : > { %s2250_s27 = sand.u32 1, %s2044_s20   ;;  %s1504_s30 = sshll.u32 %s2048_s21, 6 }
  0x49   : > { %s2604_s17 = scalar_select %p2241_p5, 1, 0 }
  0x4a   : > { %s1503_s6 = sshll.u32 %s2250_s27, 2  ;;  %s2257_s9 = scalar_lea.hbm %s2589_s0, %s1504_s30 }
  0x4b   : > { %s221_s10 = scalar_lea.vmem [#allocation2], %s1503_s6  ;;  %p2261_p11 = pnand %p1719_p7, %p45_p9 }
  0x4c   : > { %s228_s11 = sshll.u32 %s221_s10, 4  ;;  %s1505_s12 = sshll.u32 %s2250_s27, 3  ;;  %s2259_s11 = int_to_ptr.vmem [resolvable:$true] %s228_s11 }
  0x4d   : > { %s218_s13 = scalar_lea.sflag [#allocation3], %s2250_s27  ;;  %s1882_s14 = scalar_lea.hbm %s2257_s9, 64 }
  0x4e   : > { %p1883_p12 = scmp.ne.s32.totalorder %s2257_s9, %s1882_s14  ;;  %p1884_p0 = pneg %p2261_p11 }
  0x4f   : > { %s1887_s6 = scalar_lea.hbm %s2589_s0, 128  ;;  %p1888_p13 = scmp.lt.u32.totalorder %s2257_s9, %s2589_s0 }
  0x50   : > { %p1885_p2 = pnand %p1884_p0, %p1883_p12  ;;  %p1889_p6 = scmp.lt.u32.totalorder %s1887_s6, %s1882_s14 }
  0x51   : > { %p1891_p3 = scmp.lt.u32.totalorder %s1882_s14, %s2257_s9 }
  0x52   : > { %p1886_p1 = pneg %p1885_p2  ;;  %p1890_p10 = por %p1889_p6, %p1888_p13 }
  0x54   : > { %p1892_p7 = por %p1891_p3, %p1890_p10 }
  0x56   : > { %p1893_p9 = pnand %p1892_p7, %p1886_p1 }
  0x58   : > { %1896 = shalt.err (!%p1893_p9)
}
  0x59   : > { %s1897_s8 = scalar_lea.vmem %s2259_s11, 64  ;;  %s2054_s10 = smov [#allocation2]  }
  0x5a   : > { %p1898_p12 = scmp.ne.s32.totalorder %s2259_s11, %s1897_s8  ;;  %s1902_s29 = sshll.u32 %s2054_s10, 4  ;;  %s1903_s29 = int_to_ptr.vmem [resolvable:$false] %s1902_s29 }
  0x5b   : > { %s1904_s16 = scalar_lea.vmem %s1903_s29, 128  ;;  %p1905_p4 = scmp.lt.s32.totalorder %s2259_s11, %s1903_s29 }
  0x5c   : > { %p1900_p2 = pnand %p1898_p12, %p1884_p0  ;;  %p1906_p13 = scmp.lt.s32.totalorder %s1904_s16, %s1897_s8 }
  0x5e   : > { %p1901_p5 = pneg %p1900_p2  ;;  %p1907_p6 = por %p1906_p13, %p1905_p4 }
  0x60   : > { %p1908_p10 = pnand %p1907_p6, %p1901_p5 }
  0x62   : > { %1911 = shalt.err (!%p1908_p10)
}
  0x63   : > { %1706 = dma.hbm_to_vmem [thread:$0]  (!%p2261_p11), %s2257_s9, 64, %s2259_s11, %s218_s13  }
  0x64   : > { %s1506_s14 = sshll.u32 %s2048_s21, 7  ;;  %s239_s6 = scalar_lea.vmem [#allocation8], %s1505_s12 }
  0x65   : > { %s246_s30 = sshll.u32 %s239_s6, 4  ;;  %s2298_s8 = scalar_lea.hbm %s2592_s3, %s1506_s14  ;;  %s247_s30 = int_to_ptr.vmem [resolvable:$true] %s246_s30 }
  0x66   : > { %s236_s29 = scalar_lea.sflag [#allocation9], %s2250_s27  ;;  %s1912_s16 = scalar_lea.hbm %s2298_s8, 128 }
  0x67   : > { %p1913_p4 = scmp.ne.s32.totalorder %s2298_s8, %s1912_s16  ;;  %s1917_s12 = scalar_lea.hbm %s2592_s3, 256 }
  0x68   : > { %p1918_p3 = scmp.lt.u32.totalorder %s2298_s8, %s2592_s3  ;;  %p1919_p7 = scmp.lt.u32.totalorder %s1917_s12, %s1912_s16 }
  0x69   : > { %p1915_p5 = pnand %p1913_p4, %p1884_p0  ;;  %p1921_p12 = scmp.lt.u32.totalorder %s1912_s16, %s2298_s8 }
  0x6a   : > { %p1920_p9 = por %p1919_p7, %p1918_p3 }
  0x6b   : > { %p1916_p1 = pneg %p1915_p5 }
  0x6c   : > { %p1922_p2 = por %p1921_p12, %p1920_p9 }
  0x6e   : > { %p1923_p13 = pnand %p1922_p2, %p1916_p1 }
  0x70   : > { %1926 = shalt.err (!%p1923_p13)
}
  0x71   : > { %s1927_s27 = scalar_lea.vmem %s247_s30, 128  ;;  %s2055_s14 = smov [#allocation8]  }
  0x72   : > { %p1928_p6 = scmp.ne.s32.totalorder %s247_s30, %s1927_s27  ;;  %s1932_s7 = sshll.u32 %s2055_s14, 4  ;;  %s1933_s7 = int_to_ptr.vmem [resolvable:$false] %s1932_s7 }
  0x73   : > { %s1934_s10 = scalar_lea.vmem %s1933_s7, 256  ;;  %p1935_p5 = scmp.lt.s32.totalorder %s247_s30, %s1933_s7 }
  0x74   : > { %p1930_p10 = pnand %p1928_p6, %p1884_p0  ;;  %p1936_p8 = scmp.lt.s32.totalorder %s1934_s10, %s1927_s27 }
  0x76   : > { %p1931_p4 = pneg %p1930_p10  ;;  %p1937_p3 = por %p1936_p8, %p1935_p5 }
  0x78   : > { %p1938_p7 = pnand %p1937_p3, %p1931_p4 }
  0x7a   : > { %1941 = shalt.err (!%p1938_p7)
}
  0x7b   : > { %1709 = dma.hbm_to_vmem [thread:$0]  (!%p2261_p11), %s2298_s8, 128, %s247_s30, %s236_s29  }
  0x7c   : > { %p2606_p1 = scmp.ne.s32.totalorder %s2601_s26, 0 }
  0x7d   : > { %s2323_s16 = sand.u32 (!%p2606_p1), 1, %s2040_s19   ;;  %p2607_p0 = scmp.ne.s32.totalorder (!%p2606_p1), %s2599_s24, 0 }
  0x7e   : > { %255 = sbr.rel (%p2606_p1) target bundleno = 1984 (0x7c0), region = 36  ;;  %s1508_s9 = sshll.u32 (!%p2606_p1), %s2323_s16, 2 }
  0x7f   : > { %s258_s11 = scalar_lea.sflag (!%p2606_p1), [#allocation3], %s2323_s16  ;;  %s261_s12 = scalar_lea.vmem (!%p2606_p1), [#allocation2], %s1508_s9 }
  0x85   : > { %2015 = dma.done.wait (%p2607_p0), %s258_s11, 64  }
  0x86   : > { %2017 = vsyncadd (%p2607_p0), %s258_s11, 4294967232  ;;  %p2608_p8 = scmp.eq.s32.totalorder %s2141_s22, 0 }
  0x88   : > { %2019 = dma.done.wait (%p2608_p8), [#allocation6], 272   ;;  %p2609_p11 = pmov %p2608_p8 }
  0x89   : > { %s2336_s26 = sshll.u32 %s2323_s16, 3  ;;  %s275_s28 = scalar_lea.sflag [#allocation9], %s2323_s16 }
  0x8a   : > { %2021 = vsyncadd (%p2609_p11), [#allocation6], 4294967024  ;;  %s278_s30 = scalar_lea.vmem [#allocation8], %s2336_s26 }
  0x8b   : > { %2023 = dma.done.wait (%p2607_p0), %s275_s28, 128  }
  0x8c   : > { %2025 = vsyncadd (%p2607_p0), %s275_s28, 4294967168  ;;  %v2056_v0 = vmov 0.0   ;;  %vm2057_vm0 = vmmov 0   ;;  %v316_v1 = vld [vmem:[%s261_s12] sm:$0xf]  ;;  %s2058_s8 = smov 96  }
  0x8d   : > { %1576 = vmatprep.subr.bf16.mxu0 %v2056_v0  ;;  %1578 = vmatprep.mubr.msk.bf16.mxu0 %vm2057_vm0, %v2056_v0  ;;  %v2350_v2 = vcombine.low %v316_v1, %v316_v1  ;;  %vm322_vm1 = vcmask 31744   ;;  %s2059_s24 = smov 64   ;;  %s2060_s29 = smov 92   ;;  %vm369_vm2 = vcmask 64512   ;;  %vm387_vm3 = vcmask 1043456  }
  0x8e   : > { %1582 = vmatprep.subr.bf16.mxu1 %v2056_v0  ;;  %1584 = vmatprep.mubr.msk.bf16.mxu1 %vm2057_vm0, %v2056_v0  ;;  %s2061_s13 = smov 84   ;;  %s2062_s6 = smov 72   ;;  %vm1238_vm4 = vcmask 97280   ;;  %vm1240_vm5 = vcmask 130048   ;;  %vm1242_vm6 = vcmask 162816   ;;  %vm1244_vm7 = vcmask 195584  }
  0x8f   : > { %320 = vrot.lane.b32.xlu0 %v2350_v2, %s2058_s8  ;;  %382 = vrot.lane.b32.xlu1 %v2350_v2, %s2059_s24  ;;  %s2063_s27 = smov 68   ;;  %s2064_s14 = smov 124   ;;  %vm1246_vm8 = vcmask 228352   ;;  %vm1265_vm9 = vcmask 261120  }
  0x90   : > { %s2065_s7 = smov 88   ;;  %s2066_s10 = smov 120  }
  0x91   : > { %s2067_s9 = smov 116   ;;  %s2068_s11 = smov 80  }
  0x92   : > { %s2069_s12 = smov 112   ;;  %s2070_s28 = smov 76  }
  0x93   : > { %433 = vrot.lane.b32.xlu1 %v2350_v2, %s2060_s29  ;;  %s2071_s8 = smov 108   ;;  %s2072_s24 = smov 104  }
  0x94   : > { %s2073_s29 = smov 100   ;;  %p2610_p12 = scmp.ne.s32.totalorder %s2604_s17, 0 }
 0x101   : > { %v321_v3 = vpop.permute.xlu0 %320  ;;  %v383_v10 = vpop.permute.xlu1 %382 }
 0x102   : > { %v327_v4 = vsel %vm322_vm1, %v321_v3, 0  ;;  %v389_v11 = vsel %vm387_vm3, %v383_v10, 0 }
 0x103   : > { %1577 = vmatpush3.bf16.xpose.msra.mxu0 %v327_v4  ;;  %1583 = vmatpush3.bf16.msra.mxu1 %v389_v11 }
 0x104   : > { %1594 = vmatprep.subr.bf16.mxu0 %v2056_v0  ;;  %1588 = vmatprep.subr.bf16.mxu1 %v2056_v0 }
 0x105   : > { %v434_v17 = vpop.permute.xlu1 %433 }
 0x106   : > { %v439_v24 = vsel %vm322_vm1, %v434_v17, 0 }
 0x10a   : > { %1579 = vmatmul.mubr.msk.bf16.vlgmr.msra.gmra.mrb[0].mxu0 %vm322_vm1, %v316_v1 }
 0x10b   : > { %1596 = vmatprep.mubr.msk.bf16.mxu0 %vm2057_vm0, %v2056_v0 }
 0x1dd   : > { %v363_v5 = vpop.f32.mrb[0].mxu0 }
 0x1de   : > { %v1580_v6 = vpop.f32.mrb[1].mxu0  ;;  %v370_v7 = vsel %vm369_vm2, %v363_v5, -inf }
 0x1df   : > { %371 = vmax.xlane.f32.xlu0 %v370_v7  ;;  %v366_v8 = vpop.f32.mrb[2].mxu0 }
 0x1e0   : > { %v1581_v9 = vpop.f32.mrb[3].mxu0 }
 0x1f5   : > { %655 = vrot.lane.b32.xlu0 %v2350_v2, %s2061_s13  ;;  %s2074_s13 = smov 56  }
 0x1f9   : > { %988 = vrot.lane.b32.xlu0 %v2350_v2, %s2062_s6  ;;  %s2075_s6 = smov 60  }
 0x1fd   : > { %1099 = vrot.lane.b32.xlu0 %v2350_v2, %s2063_s27  ;;  %s2076_s27 = smov 52  }
 0x26c   : > { %v372_v12 = vpop.xlane.xlu0 %371 }
 0x26d   : > { %v373_v13 = vsub.f32 %v363_v5, %v372_v12 }
 0x26f   : > { %v374_v14 = vmul.f32 1.442695, %v373_v13 }
 0x270   : > { %v656_v28 = vpop.permute.xlu0 %655 }
 0x271   : > { %1794 = vpow2.f32 %v374_v14  ;;  %v661_v29 = vsel %vm322_vm1, %v656_v28, 0 }
 0x274   : > { %v989_v35 = vpop.permute.xlu0 %988 }
 0x275   : > { %v994_v37 = vsel %vm322_vm1, %v989_v35, 0 }
 0x278   : > { %v1100_v38 = vpop.permute.xlu0 %1099 }
 0x279   : > { %v1105_v40 = vsel %vm322_vm1, %v1100_v38, 0 }
 0x27b   : > { %v1795_v15 = vpop.eup %1794 }
 0x27c   : > { %v376_v16 = vsel %vm369_vm2, %v1795_v15, 0.0 }
 0x27d   : > { %377 = vadd.xlane.f32.xlu1 %v376_v16 }
 0x28e   : > { %431 = vrot.lane.b32.xlu1 %v2350_v2, %s2064_s14  ;;  %s2077_s14 = smov 48  }
 0x292   : > { %544 = vrot.lane.b32.xlu1 %v2350_v2, %s2065_s7  ;;  %s2078_s7 = smov 40  }
 0x296   : > { %542 = vrot.lane.b32.xlu1 %v2350_v2, %s2066_s10  ;;  %s2079_s10 = smov 36  }
 0x29a   : > { %653 = vrot.lane.b32.xlu1 %v2350_v2, %s2067_s9  ;;  %s2080_s9 = smov 44  }
 0x29e   : > { %766 = vrot.lane.b32.xlu1 %v2350_v2, %s2068_s11  ;;  %s314_s11 = scalar_lea.vmem [#allocation11], %s2336_s26 }
 0x2a2   : > { %764 = vrot.lane.b32.xlu1 %v2350_v2, %s2069_s12  ;;  %s2081_s12 = smov 4  }
 0x2a6   : > { %877 = vrot.lane.b32.xlu1 %v2350_v2, %s2070_s28  ;;  %s2082_s28 = smov 8  }
 0x2aa   : > { %875 = vrot.lane.b32.xlu1 %v2350_v2, %s2071_s8  ;;  %s2083_s8 = smov 12  }
 0x2ae   : > { %986 = vrot.lane.b32.xlu1 %v2350_v2, %s2072_s24  ;;  %s2084_s24 = smov 16  }
 0x2b2   : > { %1097 = vrot.lane.b32.xlu1 %v2350_v2, %s2073_s29  ;;  %s2085_s29 = smov 20  }
 0x30a   : > { %v378_v18 = vpop.xlane.xlu1 %377 }
 0x30b   : > { %1796 = vrcp.f32 %v378_v18 }
 0x30e   : > { %v432_v19 = vpop.permute.xlu1 %431 }
 0x312   : > { %v545_v23 = vpop.permute.xlu1 %544 }
 0x313   : > { %v550_v26 = vsel %vm322_vm1, %v545_v23, 0 }
 0x315   : > { %v1797_v20 = vpop.eup %1796 }
 0x316   : > { %v2377_v21 = vmul.f32 %v1797_v20, %v1795_v15  ;;  %v543_v25 = vpop.permute.xlu1 %542 }
 0x318   : > { %v381_v22 = vpack.c.bf16 %v2377_v21, %v2377_v21 }
 0x31a   : > { %1585 = vmatmul.mubr.msk.bf16.vlgmr.msra.gmra.mrb[0].mxu1 %vm369_vm2, %v381_v22  ;;  %v654_v27 = vpop.permute.xlu1 %653 }
 0x31b   : > { %1589 = vmatpush3.bf16.xpose.msra.mxu1 %v439_v24  ;;  %1590 = vmatprep.mubr.msk.bf16.mxu1 %vm2057_vm0, %v2056_v0 }
 0x31c   : > { %1600 = vmatprep.subr.bf16.mxu1 %v2056_v0 }
 0x31e   : > { %v767_v30 = vpop.permute.xlu1 %766 }
 0x31f   : > { %v772_v32 = vsel %vm322_vm1, %v767_v30, 0 }
 0x322   : > { %1591 = vmatmul.mubr.msk.bf16.vlgmr.msra.gmra.mrb[4].mxu1 %vm322_vm1, %v432_v19  ;;  %v765_v31 = vpop.permute.xlu1 %764 }
 0x323   : > { %1601 = vmatpush3.bf16.xpose.msra.mxu1 %v550_v26  ;;  %1602 = vmatprep.mubr.msk.bf16.mxu1 %vm2057_vm0, %v2056_v0 }
 0x324   : > { %1612 = vmatprep.subr.bf16.mxu1 %v2056_v0 }
 0x326   : > { %v878_v33 = vpop.permute.xlu1 %877 }
 0x327   : > { %v883_v34 = vsel %vm322_vm1, %v878_v33, 0 }
 0x32a   : > { %1603 = vmatmul.mubr.msk.bf16.vlgmr.msra.gmra.mrb[8].mxu1 %vm322_vm1, %v543_v25  ;;  %v876_v36 = vpop.permute.xlu1 %875 }
 0x32b   : > { %1613 = vmatpush3.bf16.xpose.msra.mxu1 %v661_v29  ;;  %1614 = vmatprep.mubr.msk.bf16.mxu1 %vm2057_vm0, %v2056_v0 }
 0x32c   : > { %1624 = vmatprep.subr.bf16.mxu1 %v2056_v0 }
 0x32e   : > { %v987_v39 = vpop.permute.xlu1 %986 }
 0x332   : > { %1615 = vmatmul.mubr.msk.bf16.vlgmr.msra.gmra.mrb[12].mxu1 %vm322_vm1, %v654_v27  ;;  %v1098_v41 = vpop.permute.xlu1 %1097 }
 0x333   : > { %1625 = vmatpush3.bf16.xpose.msra.mxu1 %v772_v32  ;;  %1626 = vmatprep.mubr.msk.bf16.mxu1 %vm2057_vm0, %v2056_v0 }
 0x334   : > { %1636 = vmatprep.subr.bf16.mxu1 %v2056_v0 }
 0x33a   : > { %1627 = vmatmul.mubr.msk.bf16.vlgmr.msra.gmra.mrb[16].mxu1 %vm322_vm1, %v765_v31 }
 0x33b   : > { %1637 = vmatpush3.bf16.xpose.msra.mxu1 %v883_v34  ;;  %1638 = vmatprep.mubr.msk.bf16.mxu1 %vm2057_vm0, %v2056_v0 }
 0x33c   : > { %1648 = vmatprep.subr.bf16.mxu1 %v2056_v0 }
 0x342   : > { %1639 = vmatmul.mubr.msk.bf16.vlgmr.msra.gmra.mrb[20].mxu1 %vm322_vm1, %v876_v36 }
 0x343   : > { %1649 = vmatpush3.bf16.xpose.msra.mxu1 %v994_v37  ;;  %1650 = vmatprep.mubr.msk.bf16.mxu1 %vm2057_vm0, %v2056_v0 }
 0x344   : > { %1660 = vmatprep.subr.bf16.mxu1 %v2056_v0 }
 0x34a   : > { %1651 = vmatmul.mubr.msk.bf16.vlgmr.msra.gmra.mrb[24].mxu1 %vm322_vm1, %v987_v39 }
 0x34b   : > { %1661 = vmatpush3.bf16.xpose.msra.mxu1 %v1105_v40  ;;  %1662 = vmatprep.mubr.msk.bf16.mxu1 %vm2057_vm0, %v2056_v0 }
 0x34c   : > { %1672 = vmatprep.subr.bf16.mxu1 %v2056_v0 }
 0x352   : > { %1663 = vmatmul.mubr.msk.bf16.vlgmr.msra.gmra.mrb[28].mxu1 %vm322_vm1, %v1098_v41 }
 0x353   : > { %1676 = vmatprep.mubr.msk.bf16.mxu1 %vm2057_vm0, %v2056_v0 }
 0x3ed   : > { %v2419_v42 = vpop.f32.mrb[0].mxu1 }
 0x3ee   : > { %v1586_v43 = vpop.f32.mrb[1].mxu1 }
 0x3ef   : > { %v428_v44 = vpop.f32.mrb[2].mxu1 }
 0x3f0   : > { %v1587_v45 = vpop.f32.mrb[3].mxu1 }
 0x3f5   : > { %v475_v46 = vpop.f32.mrb[4].mxu1 }
 0x3f6   : > { %v1592_v47 = vpop.f32.mrb[5].mxu1  ;;  %v481_v48 = vsel %vm369_vm2, %v475_v46, -inf }
 0x3f7   : > { %482 = vmax.xlane.f32.xlu0 %v481_v48  ;;  %v478_v49 = vpop.f32.mrb[6].mxu1 }
 0x3f8   : > { %v1593_v50 = vpop.f32.mrb[7].mxu1 }
 0x3fd   : > { %v586_v51 = vpop.f32.mrb[8].mxu1 }
 0x3fe   : > { %v1604_v52 = vpop.f32.mrb[9].mxu1  ;;  %v592_v53 = vsel %vm369_vm2, %v586_v51, -inf }
 0x3ff   : > { %593 = vmax.xlane.f32.xlu1 %v592_v53  ;;  %v589_v54 = vpop.f32.mrb[10].mxu1 }
 0x400   : > { %v1605_v55 = vpop.f32.mrb[11].mxu1 }
 0x405   : > { %v697_v56 = vpop.f32.mrb[12].mxu1 }
 0x406   : > { %v1616_v57 = vpop.f32.mrb[13].mxu1  ;;  %v703_v58 = vsel %vm369_vm2, %v697_v56, -inf }
 0x407   : > { %704 = vmax.xlane.f32.xlu0 %v703_v58  ;;  %v700_v59 = vpop.f32.mrb[14].mxu1 }
 0x408   : > { %v1617_v60 = vpop.f32.mrb[15].mxu1 }
 0x40d   : > { %v808_v61 = vpop.f32.mrb[16].mxu1 }
 0x40e   : > { %v1628_v62 = vpop.f32.mrb[17].mxu1  ;;  %v814_v63 = vsel %vm369_vm2, %v808_v61, -inf }
 0x40f   : > { %815 = vmax.xlane.f32.xlu0 %v814_v63  ;;  %v811_v1 = vpop.f32.mrb[18].mxu1 }
 0x410   : > { %v1629_v3 = vpop.f32.mrb[19].mxu1 }
 0x415   : > { %v919_v4 = vpop.f32.mrb[20].mxu1 }
 0x416   : > { %v1640_v5 = vpop.f32.mrb[21].mxu1  ;;  %v925_v6 = vsel %vm369_vm2, %v919_v4, -inf }
 0x417   : > { %926 = vmax.xlane.f32.xlu1 %v925_v6  ;;  %v922_v7 = vpop.f32.mrb[22].mxu1 }
 0x418   : > { %v1641_v8 = vpop.f32.mrb[23].mxu1 }
 0x41d   : > { %v1030_v9 = vpop.f32.mrb[24].mxu1 }
 0x41e   : > { %v1036_v10 = vsel %vm369_vm2, %v1030_v9, -inf  ;;  %v1652_v11 = vpop.f32.mrb[25].mxu1 }
 0x41f   : > { %1037 = vmax.xlane.f32.xlu0 %v1036_v10  ;;  %v1033_v12 = vpop.f32.mrb[26].mxu1 }
 0x420   : > { %v1653_v13 = vpop.f32.mrb[27].mxu1 }
 0x425   : > { %v2427_v14 = vpop.f32.mrb[28].mxu1 }
 0x426   : > { %v1664_v15 = vpop.f32.mrb[29].mxu1  ;;  %v1147_v18 = vsel %vm369_vm2, %v2427_v14, -inf }
 0x427   : > { %v1144_v16 = vpop.f32.mrb[30].mxu1 }
 0x428   : > { %604 = vrot.lane.b32.xlu1 %v2350_v2, %s2074_s13  ;;  %v1665_v17 = vpop.f32.mrb[31].mxu1  ;;  %s2086_s13 = smov 24  }
 0x435   : > { %493 = vrot.lane.b32.xlu0 %v2350_v2, %s2075_s6  ;;  %s2087_s6 = smov 28  }
 0x44c   : > { %1148 = vmax.xlane.f32.xlu1 %v1147_v18 }
 0x484   : > { %v483_v19 = vpop.xlane.xlu0 %482 }
 0x485   : > { %v484_v20 = vsub.f32 %v475_v46, %v483_v19 }
 0x487   : > { %v485_v22 = vmul.f32 1.442695, %v484_v20 }
 0x489   : > { %1798 = vpow2.f32 %v485_v22 }
 0x48c   : > { %v594_v23 = vpop.xlane.xlu1 %593 }
 0x48d   : > { %v595_v24 = vsub.f32 %v586_v51, %v594_v23 }
 0x48f   : > { %v596_v25 = vmul.f32 1.442695, %v595_v24 }
 0x491   : > { %1800 = vpow2.f32 %v596_v25 }
 0x493   : > { %v1799_v26 = vpop.eup %1798 }
 0x494   : > { %v705_v27 = vpop.xlane.xlu0 %704  ;;  %v487_v28 = vsel %vm369_vm2, %v1799_v26, 0.0 }
 0x495   : > { %v706_v29 = vsub.f32 %v697_v56, %v705_v27  ;;  %488 = vadd.xlane.f32.xlu0 %v487_v28 }
 0x497   : > { %v707_v30 = vmul.f32 1.442695, %v706_v29 }
 0x499   : > { %1802 = vpow2.f32 %v707_v30 }
 0x49b   : > { %v2434_v31 = vpop.eup %1800 }
 0x49c   : > { %v598_v32 = vsel %vm369_vm2, %v2434_v31, 0.0  ;;  %v816_v35 = vpop.xlane.xlu0 %815 }
 0x49d   : > { %599 = vadd.xlane.f32.xlu1 %v598_v32  ;;  %v817_v39 = vsub.f32 %v808_v61, %v816_v35 }
 0x49f   : > { %v818_v41 = vmul.f32 1.442695, %v817_v39 }
 0x4a1   : > { %1804 = vpow2.f32 %v818_v41 }
 0x4a3   : > { %v2438_v33 = vpop.eup %1802 }
 0x4a4   : > { %v709_v34 = vsel %vm369_vm2, %v2438_v33, 0.0  ;;  %v927_v40 = vpop.xlane.xlu1 %926 }
 0x4a5   : > { %710 = vadd.xlane.f32.xlu0 %v709_v34  ;;  %v928_v43 = vsub.f32 %v919_v4, %v927_v40 }
 0x4a7   : > { %v929_v44 = vmul.f32 1.442695, %v928_v43 }
 0x4a8   : > { %v605_v50 = vpop.permute.xlu1 %604 }
 0x4a9   : > { %1806 = vpow2.f32 %v929_v44  ;;  %v610_v1 = vsel %vm387_vm3, %v605_v50, 0 }
 0x4ab   : > { %v1805_v47 = vpop.eup %1804 }
 0x4ac   : > { %v1038_v36 = vpop.xlane.xlu0 %1037  ;;  %v820_v48 = vsel %vm369_vm2, %v1805_v47, 0.0 }
 0x4ad   : > { %v1039_v45 = vsub.f32 %v1030_v9, %v1038_v36 }
 0x4ae   : > { %715 = vrot.lane.b32.xlu1 %v2350_v2, %s2076_s27  ;;  %s1537_s27 = sshll.u32 %s2141_s22, 7 }
 0x4af   : > { %v1040_v46 = vmul.f32 1.442695, %v1039_v45 }
 0x4b0   : > { %v494_v37 = vpop.permute.xlu0 %493 }
 0x4b1   : > { %v499_v38 = vsel %vm387_vm3, %v494_v37, 0  ;;  %1808 = vpow2.f32 %v1040_v46 }
 0x4b2   : > { %1595 = vmatpush3.bf16.msra.mxu0 %v499_v38 }
 0x4b3   : > { %1606 = vmatprep.subr.bf16.mxu0 %v2056_v0  ;;  %v2447_v49 = vpop.eup %1806 }
 0x4b4   : > { %v931_v51 = vsel %vm369_vm2, %v2447_v49, 0.0 }
 0x4bb   : > { %826 = vrot.lane.b32.xlu0 %v2350_v2, %s2077_s14  ;;  %v2451_v52 = vpop.eup %1808 }
 0x4bc   : > { %v1042_v54 = vsel %vm369_vm2, %v2451_v52, 0.0 }
 0x4d2   : > { %821 = vadd.xlane.f32.xlu1 %v820_v48 }
 0x4d6   : > { %932 = vadd.xlane.f32.xlu1 %v931_v51 }
 0x4d9   : > { %v1149_v53 = vpop.xlane.xlu1 %1148 }
 0x4da   : > { %v1150_v55 = vsub.f32 %v2427_v14, %v1149_v53  ;;  %1043 = vadd.xlane.f32.xlu0 %v1042_v54 }
 0x4dc   : > { %v1151_v56 = vmul.f32 1.442695, %v1150_v55 }
 0x4de   : > { %1810 = vpow2.f32 %v1151_v56 }
 0x4e8   : > { %v2456_v57 = vpop.eup %1810 }
 0x4e9   : > { %v1153_v58 = vsel %vm369_vm2, %v2456_v57, 0.0 }
 0x4ea   : > { %1154 = vadd.xlane.f32.xlu1 %v1153_v58 }
 0x4f0   : > { %1048 = vrot.lane.b32.xlu0 %v2350_v2, %s2078_s7 }
 0x4f4   : > { %1159 = vrot.lane.b32.xlu0 %v2350_v2, %s2079_s10  ;;  %s2514_s10 = scalar_lea.hbm %s2594_s5, %s1537_s27 }
 0x4fb   : > { %937 = vrot.lane.b32.xlu1 %v2350_v2, %s2080_s9  ;;  %s1354_s9 = sshll.u32 %s314_s11, 4  ;;  %s1355_s9 = int_to_ptr.vmem [resolvable:$true] %s1354_s9 }
 0x522   : > { %v489_v59 = vpop.xlane.xlu0 %488 }
 0x523   : > { %1812 = vrcp.f32 %v489_v59 }
 0x52a   : > { %v600_v60 = vpop.xlane.xlu1 %599 }
 0x52b   : > { %1814 = vrcp.f32 %v600_v60  ;;  %v1792_v60 = vld [vmem:[#allocation5] sm:$0xff]  }
 0x52c   : > { %1673 = vmatpush3.bf16.msra.mxu1 %v1792_v60 }
 0x52d   : > { %v1813_v61 = vpop.eup %1812  ;;  %1674 = vmatprep.subr.bf16.mxu1 %v2056_v0 }
 0x52e   : > { %v491_v62 = vmul.f32 %v1813_v61, %v1799_v26  ;;  %v716_v6 = vpop.permute.xlu1 %715 }
 0x52f   : > { %v721_v9 = vsel %vm387_vm3, %v716_v6, 0 }
 0x530   : > { %v492_v63 = vpack.c.bf16 %v491_v62, %v491_v62  ;;  %v541_v4 = vadd.f32 %v491_v62, %v2377_v21 }
 0x532   : > { %1597 = vmatmul.mubr.msk.bf16.vlgmr.msra.gmra.mrb[4].mxu0 %vm369_vm2, %v492_v63  ;;  %v711_v3 = vpop.xlane.xlu0 %710 }
 0x533   : > { %1607 = vmatpush3.bf16.msra.mxu0 %v610_v1  ;;  %1816 = vrcp.f32 %v711_v3  ;;  %1608 = vmatprep.mubr.msk.bf16.mxu0 %vm2057_vm0, %v2056_v0  ;;  %v1793_v3 = vld [vmem:[#allocation5 + $0x8] sm:$0xff]  }
 0x534   : > { %1618 = vmatprep.subr.bf16.mxu0 %v2056_v0  ;;  %1675 = vmatpush3.bf16.msra.mxu1 %v1793_v3 }
 0x535   : > { %v1815_v2 = vpop.eup %1814 }
 0x536   : > { %v602_v5 = vmul.f32 %v1815_v2, %v2434_v31  ;;  %v827_v12 = vpop.permute.xlu0 %826 }
 0x537   : > { %v832_v13 = vsel %vm387_vm3, %v827_v12, 0 }
 0x538   : > { %v652_v7 = vadd.f32 %v602_v5, %v541_v4  ;;  %v603_v8 = vpack.c.bf16 %v602_v5, %v602_v5 }
 0x53a   : > { %1609 = vmatmul.mubr.msk.bf16.vlgmr.msra.gmra.mrb[8].mxu0 %vm369_vm2, %v603_v8 }
 0x53b   : > { %1619 = vmatpush3.bf16.msra.mxu0 %v721_v9  ;;  %1620 = vmatprep.mubr.msk.bf16.mxu0 %vm2057_vm0, %v2056_v0 }
 0x53c   : > { %1630 = vmatprep.subr.bf16.mxu0 %v2056_v0 }
 0x53d   : > { %v1817_v10 = vpop.eup %1816 }
 0x53e   : > { %v713_v11 = vmul.f32 %v1817_v10, %v2438_v33 }
 0x540   : > { %v714_v21 = vpack.c.bf16 %v713_v11, %v713_v11  ;;  %v763_v28 = vadd.f32 %v713_v11, %v652_v7 }
 0x542   : > { %1621 = vmatmul.mubr.msk.bf16.vlgmr.msra.gmra.mrb[12].mxu0 %vm369_vm2, %v714_v21 }
 0x543   : > { %1631 = vmatpush3.bf16.msra.mxu0 %v832_v13  ;;  %1632 = vmatprep.mubr.msk.bf16.mxu0 %vm2057_vm0, %v2056_v0 }
 0x544   : > { %1642 = vmatprep.subr.bf16.mxu0 %v2056_v0 }
 0x55f   : > { %v822_v14 = vpop.xlane.xlu1 %821 }
 0x560   : > { %1818 = vrcp.f32 %v822_v14 }
 0x563   : > { %v933_v16 = vpop.xlane.xlu1 %932 }
 0x564   : > { %1820 = vrcp.f32 %v933_v16 }
 0x567   : > { %v1044_v19 = vpop.xlane.xlu0 %1043 }
 0x568   : > { %1822 = vrcp.f32 %v1044_v19 }
 0x56a   : > { %v1819_v15 = vpop.eup %1818 }
 0x56b   : > { %v824_v17 = vmul.f32 %v1819_v15, %v1805_v47  ;;  %v1049_v25 = vpop.permute.xlu0 %1048 }
 0x56c   : > { %v1054_v30 = vsel %vm387_vm3, %v1049_v25, 0 }
 0x56d   : > { %v825_v18 = vpack.c.bf16 %v824_v17, %v824_v17  ;;  %v874_v31 = vadd.f32 %v824_v17, %v763_v28 }
 0x56e   : > { %v1821_v20 = vpop.eup %1820 }
 0x56f   : > { %1633 = vmatmul.mubr.msk.bf16.vlgmr.msra.gmra.mrb[16].mxu0 %vm369_vm2, %v825_v18  ;;  %v935_v23 = vmul.f32 %v1821_v20, %v2447_v49  ;;  %v1160_v37 = vpop.permute.xlu0 %1159 }
 0x570   : > { %1644 = vmatprep.mubr.msk.bf16.mxu0 %vm2057_vm0, %v2056_v0  ;;  %v1165_v40 = vsel %vm387_vm3, %v1160_v37, 0 }
 0x571   : > { %v936_v29 = vpack.c.bf16 %v935_v23, %v935_v23  ;;  %v985_v33 = vadd.f32 %v935_v23, %v874_v31 }
 0x572   : > { %v1823_v26 = vpop.eup %1822 }
 0x573   : > { %v1046_v32 = vmul.f32 %v1823_v26, %v2451_v52 }
 0x575   : > { %v1096_v35 = vadd.f32 %v1046_v32, %v985_v33  ;;  %v1047_v39 = vpack.c.bf16 %v1046_v32, %v1046_v32 }
 0x577   : > { %v1155_v22 = vpop.xlane.xlu1 %1154 }
 0x578   : > { %1824 = vrcp.f32 %v1155_v22 }
 0x57b   : > { %v938_v24 = vpop.permute.xlu1 %937 }
 0x57c   : > { %v943_v27 = vsel %vm387_vm3, %v938_v24, 0 }
 0x57d   : > { %1643 = vmatpush3.bf16.msra.mxu0 %v943_v27 }
 0x57e   : > { %1654 = vmatprep.subr.bf16.mxu0 %v2056_v0 }
 0x580   : > { %1645 = vmatmul.mubr.msk.bf16.vlgmr.msra.gmra.mrb[20].mxu0 %vm369_vm2, %v936_v29 }
 0x581   : > { %1655 = vmatpush3.bf16.msra.mxu0 %v1054_v30  ;;  %1656 = vmatprep.mubr.msk.bf16.mxu0 %vm2057_vm0, %v2056_v0 }
 0x582   : > { %v1825_v34 = vpop.eup %1824  ;;  %1666 = vmatprep.subr.bf16.mxu0 %v2056_v0 }
 0x583   : > { %v1157_v36 = vmul.f32 %v1825_v34, %v2456_v57 }
 0x585   : > { %v1207_v38 = vadd.f32 %v1157_v36, %v1096_v35  ;;  %v1158_v43 = vpack.c.bf16 %v1157_v36, %v1157_v36 }
 0x587   : > { %v1320_v41 = vmul.f32 0.125, %v1207_v38 }
 0x588   : > { %1657 = vmatmul.mubr.msk.bf16.vlgmr.msra.gmra.mrb[24].mxu0 %vm369_vm2, %v1047_v39 }
 0x589   : > { %1667 = vmatpush3.bf16.msra.mxu0 %v1165_v40  ;;  %1668 = vmatprep.mubr.msk.bf16.mxu0 %vm2057_vm0, %v2056_v0  ;;  %1321 = vst.msk [vmem:[%s314_s11] sm:$0xff] %vm369_vm2, %v1320_v41 }
 0x590   : > { %1669 = vmatmul.mubr.msk.bf16.vlgmr.msra.gmra.mrb[28].mxu0 %vm369_vm2, %v1158_v43 }
 0x605   : > { %v535_v44 = vpop.f32.mrb[4].mxu0 }
 0x606   : > { %1209 = vrot.lane.b32.xlu1 %v535_v44, %s2081_s12  ;;  %v1598_v45 = vpop.f32.mrb[5].mxu0  ;;  %s1328_s12 = scalar_lea.sflag [#allocation12], %s2323_s16 }
 0x607   : > { %v538_v46 = vpop.f32.mrb[6].mxu0 }
 0x608   : > { %v1599_v47 = vpop.f32.mrb[7].mxu0 }
 0x60d   : > { %v646_v48 = vpop.f32.mrb[8].mxu0 }
 0x60e   : > { %1213 = vrot.lane.b32.xlu0 %v646_v48, %s2082_s28  ;;  %v1610_v49 = vpop.f32.mrb[9].mxu0  ;;  %s1942_s28 = scalar_lea.vmem %s1355_s9, 128 }
 0x60f   : > { %v649_v50 = vpop.f32.mrb[10].mxu0  ;;  %p1943_p9 = scmp.ne.s32.totalorder %s1355_s9, %s1942_s28 }
 0x610   : > { %v1611_v51 = vpop.f32.mrb[11].mxu0 }
 0x611   : > { %p1944_p2 = pnand %p1943_p9, %p2610_p12 }
 0x613   : > { %p1945_p13 = pneg %p1944_p2 }
 0x615   : > { %v757_v52 = vpop.f32.mrb[12].mxu0 }
 0x616   : > { %1217 = vrot.lane.b32.xlu1 %v757_v52, %s2083_s8  ;;  %v1622_v53 = vpop.f32.mrb[13].mxu0  ;;  %s2088_s8 = smov [#allocation11]  }
 0x617   : > { %v760_v54 = vpop.f32.mrb[14].mxu0 }
 0x618   : > { %v1623_v55 = vpop.f32.mrb[15].mxu0 }
 0x642   : > { %v868_v56 = vpop.f32.mrb[16].mxu0 }
 0x643   : > { %1221 = vrot.lane.b32.xlu0 %v868_v56, %s2084_s24  ;;  %v1634_v57 = vpop.f32.mrb[17].mxu0  ;;  %s1946_s24 = sshll.u32 %s2088_s8, 4  ;;  %s1947_s24 = int_to_ptr.vmem [resolvable:$false] %s1946_s24 }
 0x644   : > { %v871_v58 = vpop.f32.mrb[18].mxu0  ;;  %p1949_p6 = scmp.lt.s32.totalorder %s1355_s9, %s1947_s24 }
 0x645   : > { %v1635_v59 = vpop.f32.mrb[19].mxu0 }
 0x653   : > { %v979_v61 = vpop.f32.mrb[20].mxu0 }
 0x654   : > { %1225 = vrot.lane.b32.xlu1 %v979_v61, %s2085_s29  ;;  %v1646_v62 = vpop.f32.mrb[21].mxu0  ;;  %s1948_s29 = scalar_lea.vmem %s1947_s24, 256 }
 0x655   : > { %v982_v63 = vpop.f32.mrb[22].mxu0  ;;  %p1950_p10 = scmp.lt.s32.totalorder %s1948_s29, %s1942_s28 }
 0x656   : > { %v1647_v1 = vpop.f32.mrb[23].mxu0 }
 0x657   : > { %p1951_p4 = por %p1950_p10, %p1949_p6 }
 0x659   : > { %p1952_p5 = pnand %p1951_p4, %p1945_p13 }
 0x65b   : > { %v1090_v2 = vpop.f32.mrb[24].mxu0 }
 0x65c   : > { %1229 = vrot.lane.b32.xlu0 %v1090_v2, %s2086_s13  ;;  %v1658_v4 = vpop.f32.mrb[25].mxu0 }
 0x65d   : > { %v1093_v5 = vpop.f32.mrb[26].mxu0 }
 0x65e   : > { %v1659_v6 = vpop.f32.mrb[27].mxu0 }
 0x663   : > { %v1201_v7 = vpop.f32.mrb[28].mxu0 }
 0x664   : > { %1233 = vrot.lane.b32.xlu1 %v1201_v7, %s2087_s6  ;;  %v1670_v8 = vpop.f32.mrb[29].mxu0 }
 0x665   : > { %v1204_v9 = vpop.f32.mrb[30].mxu0 }
 0x666   : > { %v1671_v0 = vpop.f32.mrb[31].mxu0 }
 0x678   : > { %v1210_v10 = vpop.permute.xlu1 %1209 }
 0x679   : > { %v1236_v13 = vsel %vm322_vm1, %v2419_v42, %v1210_v10 }
 0x680   : > { %v1214_v11 = vpop.permute.xlu0 %1213 }
 0x681   : > { %v1237_v14 = vsel %vm369_vm2, %v1236_v13, %v1214_v11 }
 0x688   : > { %v1218_v12 = vpop.permute.xlu1 %1217 }
 0x689   : > { %v1239_v16 = vsel %vm1238_vm4, %v1237_v14, %v1218_v12 }
 0x6b5   : > { %v1222_v21 = vpop.permute.xlu0 %1221 }
 0x6b6   : > { %v1241_v18 = vsel %vm1240_vm5, %v1239_v16, %v1222_v21 }
 0x6c6   : > { %v1226_v15 = vpop.permute.xlu1 %1225 }
 0x6c7   : > { %v1243_v19 = vsel %vm1242_vm6, %v1241_v18, %v1226_v15 }
 0x6ce   : > { %v1230_v17 = vpop.permute.xlu0 %1229 }
 0x6cf   : > { %v1245_v20 = vsel %vm1244_vm7, %v1243_v19, %v1230_v17 }
 0x6d6   : > { %v1234_v22 = vpop.permute.xlu1 %1233 }
 0x6d7   : > { %v1247_v23 = vsel %vm1246_vm8, %v1245_v20, %v1234_v22 }
 0x6d8   : > { %v1248_v42 = vpack.c.bf16 %v1247_v23, %v1247_v23 }
 0x6da   : > { %1677 = vmatmul.mubr.msk.bf16.vlgmr.msra.gmra.mrb[32].mxu1 %vm1265_vm9, %v1248_v42 }
 0x6db   : > { %1955 = shalt.err (!%p1952_p5)
}
 0x6dc   : > { %s1956_s11 = scalar_lea.hbm %s2514_s10, 128  ;;  %s1960_s14 = scalar_lea.hbm %s2594_s5, 256 }
 0x6dd   : > { %p1957_p3 = scmp.ne.s32.totalorder %s2514_s10, %s1956_s11  ;;  %p1961_p0 = scmp.lt.u32.totalorder %s2514_s10, %s2594_s5 }
 0x6de   : > { %p1962_p8 = scmp.lt.u32.totalorder %s1960_s14, %s1956_s11  ;;  %p1964_p9 = scmp.lt.u32.totalorder %s1956_s11, %s2514_s10 }
 0x6df   : > { %p1958_p7 = pnand %p1957_p3, %p2610_p12 }
 0x6e0   : > { %p1963_p11 = por %p1962_p8, %p1961_p0 }
 0x6e1   : > { %p1959_p1 = pneg %p1958_p7 }
 0x6e2   : > { %p1965_p2 = por %p1964_p9, %p1963_p11 }
 0x6e4   : > { %p1966_p13 = pnand %p1965_p2, %p1959_p1 }
 0x6e6   : > { %1969 = shalt.err (!%p1966_p13)
}
 0x6e7   : > { %1693 = dma.vmem_to_hbm [thread:$0]  (%p2610_p12), %s1355_s9, 128, %s2514_s10, %s1328_s12   ;;  %v1309_v24 = vld [vmem:[%s278_s30] sm:$0xff]  ;;  %v1534_v26 = vld [vmem:[#allocation7] ss:$0 sm:$0xff] }
 0x6e8   : > { %s307_s28 = scalar_lea.vmem [#allocation10], %s2336_s26  ;;  %s2544_s13 = scalar_lea.hbm %s2593_s4, %s1537_s27 }
 0x6e9   : > { %s1341_s24 = sshll.u32 %s307_s28, 4  ;;  %s1323_s26 = scalar_lea.sflag [#allocation4], %s2323_s16  ;;  %s2546_s24 = int_to_ptr.vmem [resolvable:$true] %s1341_s24 }
 0x6ea   : > { %s1970_s30 = scalar_lea.vmem %s2546_s24, 128  ;;  %s2089_s10 = smov [#allocation10]  }
 0x6eb   : > { %p1971_p6 = scmp.ne.s32.totalorder %s2546_s24, %s1970_s30  ;;  %s1974_s22 = sshll.u32 %s2089_s10, 4  ;;  %s1975_s22 = int_to_ptr.vmem [resolvable:$false] %s1974_s22 }
 0x6ec   : > { %s1976_s9 = scalar_lea.vmem %s1975_s22, 256  ;;  %p1977_p5 = scmp.lt.s32.totalorder %s2546_s24, %s1975_s22 }
 0x6ed   : > { %p1972_p10 = pnand %p1971_p6, %p2610_p12  ;;  %p1978_p3 = scmp.lt.s32.totalorder %s1976_s9, %s1970_s30 }
 0x6ef   : > { %p1973_p4 = pneg %p1972_p10  ;;  %p1979_p7 = por %p1978_p3, %p1977_p5 }
 0x6f1   : > { %p1980_p1 = pnand %p1979_p7, %p1973_p4 }
 0x7ad   : > { %v1303_v25 = vpop.f32.mrb[32].mxu1 }
 0x7ae   : > { %v1310_v27 = vadd.f32 %v1309_v24, %v1303_v25  ;;  %v1678_v28 = vpop.f32.mrb[33].mxu1 }
 0x7af   : > { %v1306_v29 = vpop.f32.mrb[34].mxu1 }
 0x7b0   : > { %v1318_v30 = vadd.f32 %v1534_v26, %v1310_v27  ;;  %v1679_v31 = vpop.f32.mrb[35].mxu1 }
 0x7b2   : > { %1319 = vst.msk [vmem:[%s307_s28] sm:$0xff] %vm1265_vm9, %v1318_v30 }
 0x7b3   : > { %1983 = shalt.err (!%p1980_p1)
}
 0x7b4   : > { %s1984_s16 = scalar_lea.hbm %s2544_s13, 128  ;;  %s1988_s6 = scalar_lea.hbm %s2593_s4, 256 }
 0x7b5   : > { %p1985_p0 = scmp.ne.s32.totalorder %s2544_s13, %s1984_s16  ;;  %p1989_p9 = scmp.lt.u32.totalorder %s2544_s13, %s2593_s4 }
 0x7b6   : > { %p1990_p2 = scmp.lt.u32.totalorder %s1988_s6, %s1984_s16  ;;  %p1992_p6 = scmp.lt.u32.totalorder %s1984_s16, %s2544_s13 }
 0x7b7   : > { %p1986_p8 = pnand %p1985_p0, %p2610_p12 }
 0x7b8   : > { %p1991_p13 = por %p1990_p2, %p1989_p9 }
 0x7b9   : > { %p1987_p11 = pneg %p1986_p8 }
 0x7ba   : > { %p1993_p10 = por %p1992_p6, %p1991_p13 }
 0x7bc   : > { %p1994_p4 = pnand %p1993_p10, %p1987_p11 }
 0x7be   : > { %1997 = shalt.err (!%p1994_p4)
}
 0x7bf   : > { %1692 = dma.vmem_to_hbm [thread:$0]  (%p2610_p12), %s2546_s24, 128, %s2544_s13, %s1323_s26  }
 0x7c0 PF: > { %s1366_s8 = sand.u32 1, %s2036_s18   ;;  %p2611_p5 = scmp.ne.s32.totalorder %s2600_s25, 0 }
 0x7c1   : > { %p2612_p3 = scmp.ge.s32.totalorder %s2048_s21, 2  ;;  %s1367_s28 = scalar_lea.sflag [#allocation4], %s1366_s8 }
 0x7c3   : > { %p1711_p7 = pnand %p2612_p3, %p2611_p5 }
 0x7c5   : > { %2027 = dma.done.wait (!%p1711_p7), %s1367_s28, 128  }
 0x7c6   : > { %2029 = vsyncadd (!%p1711_p7), %s1367_s28, 4294967168  ;;  %s1376_s29 = scalar_lea.sflag [#allocation12], %s1366_s8 }
 0x7c7   : > { %2031 = dma.done.wait (!%p1711_p7), %s1376_s29, 128  }
 0x7c8   : > { %2033 = vsyncadd (!%p1711_p7), %s1376_s29, 4294967168  ;;  %p26_p12 = scmp.ge.s32.totalorder %s2231_s15, 4   ;;  %s2613_s18 = smov %s2040_s19 }
 0x7c9   : > { %s2614_s19 = smov %s2044_s20  ;;  %s2615_s20 = smov %s2247_s23 }
 0x7ca   : > { %s2616_s21 = smov %s2231_s15  ;;  %28 = sbr.rel (!%p26_p12) target bundleno = 10 (0xa), region = 119 }
 0x7d1   :  { %1381 = vsyncpa [#allocation3], 1 }
 0x7d2   :  { %1383 = vsyncpa [#allocation3 + $0x1], 1 }
 0x7d3   :  { %1384 = vsyncpa [#allocation6], 1 }
 0x7d4   :  { %1385 = vsyncpa [#allocation9], 1 }
 0x7d5   :  { %1387 = vsyncpa [#allocation9 + $0x1], 1 }
 0x7d6   :  { %1388 = vsyncpa [#allocation4], 1 }
 0x7d7   :  { %1390 = vsyncpa [#allocation4 + $0x1], 1 }
 0x7d8   :  { %1391 = vsyncpa [#allocation12], 1 }
 0x7d9   :  { %1393 = vsyncpa [#allocation12 + $0x1], 1 }

</bundles_post_ra>
